<compile_context>
chip_gen: v5e
topology: v5e:2x2
jax: 0.10.0
libtpu: 0.0.40
codegen_flags: <defaults>
</compile_context>

<pallas_src>
import jax
import jax.numpy as jnp
from jax import lax
from jax.experimental import pallas as pl
from jax.experimental.pallas import tpu as pltpu

HID = 32           # hidden_dim
H4 = 4 * HID       # 128 -> gate vector spans exactly one vreg lane width
DPAD = 8           # padded K for the hoisted seq-input projection
SPAD = 8           # padded K for the static-feature first layer

# Column offsets inside the packed (128, 768) wide-weight slab.
_C_WHH = 0      # fused recurrent weight [whh0 | whh1]        (256 cols)
_C_WIH1 = 256   # layer-1 input weight (rows >= H zero)       (128 cols)
_C_W2 = 384     # static layer-2 weight, BN folded            (128 cols)
_C_W3 = 512     # fusion layer-1 weight, BN folded            (128 cols)
_C_W4 = 640     # fusion output weight, lane-replicated       (128 cols)

# Row offsets inside the packed (64, 128) row slab.
_R_WIH0 = 0     # seq input projection (K = DPAD)
_R_W1 = 8       # static layer-1 weight (K = SPAD)
_R_B0 = 16      # LSTM layer-0 bias (gate-scaled, 8-sublane broadcast)
_R_B1 = 24      # LSTM layer-1 bias
_R_B1S = 32     # static layer-1 bias
_R_B2S = 40     # static layer-2 bias
_R_B3 = 48      # fusion layer-1 bias
_R_B4 = 56      # fusion output bias (lane-replicated)

_VMEM = pl.BlockSpec(memory_space=pltpu.MemorySpace.VMEM)


# ------------------------------ fused kernel ----------------------------------
def _f1_fused_kernel(seq_ref, static_ref, wrec_ref, wrow_ref, out_ref):
    TB = seq_ref.shape[0]
    Bp = static_ref.shape[0]
    T = TB // Bp
    H = HID

    def bias(row):
        b = wrow_ref[row:row + 8, :]              # pre-broadcast to 8 sublanes in prep
        if Bp == 8:
            return b
        return jnp.broadcast_to(b[0:1, :], (Bp, H4))

    b0, b1 = bias(_R_B0), bias(_R_B1)
    b1s, b2s, b3, b4 = bias(_R_B1S), bias(_R_B2S), bias(_R_B3), bias(_R_B4)

    # ---- static-feature branch (BN folded, ReLU); valid lanes [0,H), rest exactly 0 ----
    s1 = jnp.maximum(
        jnp.dot(static_ref[...], wrow_ref[_R_W1:_R_W1 + SPAD, :],
                preferred_element_type=jnp.float32) + b1s, 0.0)
    s2 = jnp.maximum(
        jnp.dot(s1, wrec_ref[:, _C_W2:_C_W2 + H4],
                preferred_element_type=jnp.float32) + b2s, 0.0)

    # ---- hoisted layer-0 input projection for ALL timesteps (one MXU call, no scratch) ----
    g0 = jnp.dot(seq_ref[...], wrow_ref[_R_WIH0:_R_WIH0 + DPAD, :],
                 preferred_element_type=jnp.float32)            # (T*Bp, 4H)

    lane = lax.broadcasted_iota(jnp.int32, (Bp, H4), 1)
    is_g = (lane >= 2 * H) & (lane < 3 * H)       # tanh gate lanes
    is_l0 = lane < H                              # layer-0 / valid-state lanes

    def gates(pre, c):
        # i/f/o pre-activations were pre-scaled by 0.5 in prepare_params, so
        # sigmoid(x) == 0.5*tanh(x/2)+0.5 is exact here -> ONE tanh per gate vector.
        th = jnp.tanh(pre)
        act = jnp.where(is_g, th, 0.5 * th + 0.5)
        f_al = pltpu.roll(act, 3 * H, axis=1)     # f -> lanes [0, H)
        g_al = pltpu.roll(act, 2 * H, axis=1)     # g -> lanes [0, H)
        o_al = pltpu.roll(act, 1 * H, axis=1)     # o -> lanes [0, H)
        c_new = f_al * c + act * g_al             # act lanes [0, H) hold i
        h_new = o_al * jnp.tanh(c_new)
        # Lanes >= H carry bounded junk that only ever multiplies zero weight rows.
        return h_new, c_new

    z = jnp.zeros((Bp, H4), jnp.float32)
    h0, c0, h1, c1 = z, z, z, z
    for ts in range(T):                           # static unroll, static slices
        # one 256-wide MXU call: columns [0,128) = h0@whh0, [128,256) = h1@whh1
        comb = jnp.where(is_l0, h0, pltpu.roll(h1, H, axis=1))
        r = jnp.dot(comb, wrec_ref[:, _C_WHH:_C_WHH + 2 * H4],
                    preferred_element_type=jnp.float32)
        pre0 = g0[ts * Bp:(ts + 1) * Bp, :] + b0 + r[:, 0:H4]
        h0, c0 = gates(pre0, c0)
        pre1 = r[:, H4:2 * H4] + jnp.dot(
            h0, wrec_ref[:, _C_WIH1:_C_WIH1 + H4],
            preferred_element_type=jnp.float32) + b1
        h1, c1 = gates(pre1, c1)

    # ---- fusion head: pack [h1 | s2] into lanes [0, 2H), single clean K=128 dot ----
    comb2 = jnp.where(is_l0, h1, 0.0) + pltpu.roll(s2, H, axis=1)
    f1 = jnp.maximum(
        jnp.dot(comb2, wrec_ref[:, _C_W3:_C_W3 + H4],
                preferred_element_type=jnp.float32) + b3, 0.0)
    # w4 is lane-replicated -> result is already a lane-dense (Bp, 128) slab
    out_ref[...] = jnp.dot(f1, wrec_ref[:, _C_W4:_C_W4 + H4],
                           preferred_element_type=jnp.float32) + b4


# --------------------------- one-time parameter prep ---------------------------
def _fold_linear_bn(W, b, gamma, beta, rmean, rvar, eps=1e-5):
    """Fold inference-mode BatchNorm1d into the preceding Linear (W: (out, in))."""
    scale = gamma / jnp.sqrt(rvar + eps)
    return W * scale[:, None], (b - rmean) * scale + beta


def prepare_params(p):
    """Pre-fold / pre-transpose / pre-scale / pre-pack every weight ONCE into two slabs."""
    H = HID
    f32 = lambda x: jnp.asarray(x, jnp.float32)
    lanes = jnp.arange(H4)
    # sigmoid(x) = 0.5*tanh(x/2) + 0.5  ->  pre-scale i/f/o gate columns AND biases by 0.5
    gate_scale = jnp.where((lanes >= 2 * H) & (lanes < 3 * H), 1.0, 0.5).astype(jnp.float32)

    def pad_block(w, rows, cols):
        out = jnp.zeros((rows, cols), jnp.float32)
        return out.at[:w.shape[0], :w.shape[1]].set(w)

    def bias_rows(b_vec):                         # (n,) -> (8, 128); lanes >= n are 0
        v = pad_block(f32(b_vec)[None, :], 1, H4)
        return jnp.broadcast_to(v, (8, H4))

    # ---- LSTM (gate-scaled) ----
    wih0 = f32(p["w_ih0"]).T * gate_scale                               # (D_seq, 4H)
    assert wih0.shape[0] <= DPAD
    wih0_p = pad_block(wih0, DPAD, H4)
    b0_b = bias_rows((f32(p["b_ih0"]) + f32(p["b_hh0"])) * gate_scale)

    whh0t = f32(p["w_hh0"]).T * gate_scale                              # (H, 4H)
    whh1t = f32(p["w_hh1"]).T * gate_scale
    wih1t = f32(p["w_ih1"]).T * gate_scale
    b1_b = bias_rows((f32(p["b_ih1"]) + f32(p["b_hh1"])) * gate_scale)

    whh_fused = jnp.zeros((H4, 2 * H4), jnp.float32)
    whh_fused = whh_fused.at[0:H, 0:H4].set(whh0t)        # acts on h0 (comb lanes [0, H))
    whh_fused = whh_fused.at[H:2 * H, H4:2 * H4].set(whh1t)   # acts on h1 (comb lanes [H, 2H))
    wih1_p = pad_block(wih1t, H4, H4)

    # ---- static / fusion networks with inference-mode BatchNorm folded in ----
    w1, b1s = _fold_linear_bn(f32(p["s_w1"]), f32(p["s_b1"]), f32(p["bn1_g"]),
                              f32(p["bn1_b"]), f32(p["bn1_m"]), f32(p["bn1_v"]))
    w2, b2s = _fold_linear_bn(f32(p["s_w2"]), f32(p["s_b2"]), f32(p["bn2_g"]),
                              f32(p["bn2_b"]), f32(p["bn2_m"]), f32(p["bn2_v"]))
    w3, b3 = _fold_linear_bn(f32(p["f_w1"]), f32(p["f_b1"]), f32(p["bn3_g"]),
                             f32(p["bn3_b"]), f32(p["bn3_m"]), f32(p["bn3_v"]))
    assert w1.shape[1] <= SPAD
    w1_p = pad_block(w1.T, SPAD, H4)
    w2_p = pad_block(w2.T, H4, H4)
    w3_p = pad_block(w3.T, H4, H4)        # rows [0,H): lstm part, rows [H,2H): static part
    w4t = f32(p["f_w2"]).T                                              # (H, 1)
    w4_p = pad_block(jnp.broadcast_to(w4t, (H, H4)), H4, H4)            # lane-replicated
    b4_b = jnp.full((8, H4), f32(p["f_b2"])[0], jnp.float32)

    # Zero-padding invariants the kernel's junk-lane analysis relies on.
    assert float(jnp.abs(whh_fused[2 * H:, :]).max()) == 0.0
    assert float(jnp.abs(whh_fused[:H, H4:]).max()) == 0.0
    assert float(jnp.abs(whh_fused[H:2 * H, :H4]).max()) == 0.0
    assert float(jnp.abs(wih1_p[H:, :]).max()) == 0.0
    assert float(jnp.abs(w3_p[2 * H:, :]).max()) == 0.0

    wrec = jnp.concatenate([whh_fused, wih1_p, w2_p, w3_p, w4_p], axis=1)    # (128, 768)
    wrow = jnp.concatenate([wih0_p, w1_p, b0_b, b1_b, bias_rows(b1s),
                            bias_rows(b2s), bias_rows(b3), b4_b], axis=0)    # (64, 128)
    return dict(wrec=wrec, wrow=wrow)


# ---------------------------------- forward ------------------------------------
@jax.jit
def f1_prediction_forward(sequence, static, prep):
    """sequence: (B, T, D_seq) batch-first; static: (B, S). Returns (B,) predictions."""
    B, T, D = sequence.shape
    S = static.shape[1]
    assert D <= DPAD and S <= SPAD
    Bp = max(8, ((B + 7) // 8) * 8)                    # pad batch to full sublanes

    seq = jnp.transpose(sequence.astype(jnp.float32), (1, 0, 2))   # time-major
    seq = jnp.pad(seq, ((0, 0), (0, Bp - B), (0, DPAD - D)))
    static_p = jnp.pad(static.astype(jnp.float32), ((0, Bp - B), (0, SPAD - S)))
    seq2d = seq.reshape(T * Bp, DPAD)

    out = pl.pallas_call(
        _f1_fused_kernel,
        out_shape=jax.ShapeDtypeStruct((Bp, 128), jnp.float32),
        in_specs=[_VMEM] * 4,
        out_specs=_VMEM,
    )(seq2d, static_p, prep["wrec"], prep["wrow"])
    return out[:B, 0]                                   # matches prediction.squeeze()


# ------------------------------ pure-JAX reference ------------------------------
def _reference_forward(sequence, static, p, eps=1e-5):
    B, T, _ = sequence.shape
    H = HID

    def cell(x, h, c, wih, whh, b):
        g = x @ wih.T + h @ whh.T + b
        i = jax.nn.sigmoid(g[:, :H]); f = jax.nn.sigmoid(g[:, H:2 * H])
        gg = jnp.tanh(g[:, 2 * H:3 * H]); o = jax.nn.sigmoid(g[:, 3 * H:])
        c = f * c + i * gg
        return o * jnp.tanh(c), c

    h0 = c0 = h1 = c1 = jnp.zeros((B, H), jnp.float32)
    for t in range(T):
        x = sequence[:, t, :].astype(jnp.float32)
        h0, c0 = cell(x, h0, c0, p["w_ih0"], p["w_hh0"], p["b_ih0"] + p["b_hh0"])
        h1, c1 = cell(h0, h1, c1, p["w_ih1"], p["w_hh1"], p["b_ih1"] + p["b_hh1"])

    def bn(x, g, b, m, v):
        return (x - m) / jnp.sqrt(v + eps) * g + b

    s = jnp.maximum(bn(static @ p["s_w1"].T + p["s_b1"], p["bn1_g"], p["bn1_b"],
                       p["bn1_m"], p["bn1_v"]), 0.0)
    s = jnp.maximum(bn(s @ p["s_w2"].T + p["s_b2"], p["bn2_g"], p["bn2_b"],
                       p["bn2_m"], p["bn2_v"]), 0.0)
    cat = jnp.concatenate([h1, s], axis=1)
    f1 = jnp.maximum(bn(cat @ p["f_w1"].T + p["f_b1"], p["bn3_g"], p["bn3_b"],
                        p["bn3_m"], p["bn3_v"]), 0.0)
    return (f1 @ p["f_w2"].T + p["f_b2"]).squeeze(-1)


# ----------------------------------- main ---------------------------------------
if __name__ == "__main__":
    B, T, D_SEQ, S_DIM, H = 4, 8, 6, 5, HID

    keys = iter(jax.random.split(jax.random.PRNGKey(0), 48))

    def u(shape, bound):
        return jax.random.uniform(next(keys), shape, jnp.float32, -bound, bound)

    kH = 1.0 / jnp.sqrt(H)
    params = {
        # LSTM layer 0
        "w_ih0": u((4 * H, D_SEQ), kH), "w_hh0": u((4 * H, H), kH),
        "b_ih0": u((4 * H,), kH), "b_hh0": u((4 * H,), kH),
        # LSTM layer 1
        "w_ih1": u((4 * H, H), kH), "w_hh1": u((4 * H, H), kH),
        "b_ih1": u((4 * H,), kH), "b_hh1": u((4 * H,), kH),
        # static_network
        "s_w1": u((H, S_DIM), 1.0 / jnp.sqrt(S_DIM)), "s_b1": u((H,), 1.0 / jnp.sqrt(S_DIM)),
        "bn1_g": jnp.ones((H,)), "bn1_b": jnp.zeros((H,)),
        "bn1_m": jnp.zeros((H,)), "bn1_v": jnp.ones((H,)),
        "s_w2": u((H, H), kH), "s_b2": u((H,), kH),
        "bn2_g": jnp.ones((H,)), "bn2_b": jnp.zeros((H,)),
        "bn2_m": jnp.zeros((H,)), "bn2_v": jnp.ones((H,)),
        # final_network
        "f_w1": u((H, 2 * H), 1.0 / jnp.sqrt(2 * H)), "f_b1": u((H,), 1.0 / jnp.sqrt(2 * H)),
        "bn3_g": jnp.ones((H,)), "bn3_b": jnp.zeros((H,)),
        "bn3_m": jnp.zeros((H,)), "bn3_v": jnp.ones((H,)),
        "f_w2": u((1, H), kH), "f_b2": u((1,), kH),
    }

    sequence = jax.random.normal(next(keys), (B, T, D_SEQ), jnp.float32)
    static = jax.random.normal(next(keys), (B, S_DIM), jnp.float32)

    prep = prepare_params(params)       # one-time weight prep (fold / scale / pad / pack)

    pred = f1_prediction_forward(sequence, static, prep)
    pred = jax.block_until_ready(pred)
    assert pred.shape == (B,)

    ref = _reference_forward(sequence, static, params)
    assert jnp.allclose(pred, ref, atol=1e-4, rtol=1e-4), (pred, ref)

    print("KERNEL_OK")
</pallas_src>

<mosaic_0001>
module attributes {stable_mosaic.version = 11 : i64} {
  func.func @_f1_fused_kernel(%arg0: memref<64x8xf32, #tpu.memory_space<vmem>>, %arg1: memref<8x8xf32, #tpu.memory_space<vmem>>, %arg2: memref<128x768xf32, #tpu.memory_space<vmem>>, %arg3: memref<64x128xf32, #tpu.memory_space<vmem>>, %arg4: memref<8x128xf32, #tpu.memory_space<vmem>>) attributes {dimension_semantics = [], scalar_prefetch = 0 : i64, scratch_operands = 0 : i64, tpu.core_type = #tpu.core_type<tc>} {
    %c16 = arith.constant 16 : index
    %c0 = arith.constant 0 : index
    %0 = vector.load %arg3[%c16, %c0] : memref<64x128xf32, #tpu.memory_space<vmem>>, vector<8x128xf32>
    %c24 = arith.constant 24 : index
    %c0_0 = arith.constant 0 : index
    %1 = vector.load %arg3[%c24, %c0_0] : memref<64x128xf32, #tpu.memory_space<vmem>>, vector<8x128xf32>
    %c32 = arith.constant 32 : index
    %c0_1 = arith.constant 0 : index
    %2 = vector.load %arg3[%c32, %c0_1] : memref<64x128xf32, #tpu.memory_space<vmem>>, vector<8x128xf32>
    %c40 = arith.constant 40 : index
    %c0_2 = arith.constant 0 : index
    %3 = vector.load %arg3[%c40, %c0_2] : memref<64x128xf32, #tpu.memory_space<vmem>>, vector<8x128xf32>
    %c48 = arith.constant 48 : index
    %c0_3 = arith.constant 0 : index
    %4 = vector.load %arg3[%c48, %c0_3] : memref<64x128xf32, #tpu.memory_space<vmem>>, vector<8x128xf32>
    %c56 = arith.constant 56 : index
    %c0_4 = arith.constant 0 : index
    %5 = vector.load %arg3[%c56, %c0_4] : memref<64x128xf32, #tpu.memory_space<vmem>>, vector<8x128xf32>
    %c0_5 = arith.constant 0 : index
    %c0_6 = arith.constant 0 : index
    %6 = vector.load %arg1[%c0_5, %c0_6] : memref<8x8xf32, #tpu.memory_space<vmem>>, vector<8x8xf32>
    %c8 = arith.constant 8 : index
    %c0_7 = arith.constant 0 : index
    %7 = vector.load %arg3[%c8, %c0_7] : memref<64x128xf32, #tpu.memory_space<vmem>>, vector<8x128xf32>
    %cst = arith.constant dense<0.000000e+00> : vector<8x128xf32>
    %8 = tpu.matmul %6, %7, %cst {dimension_numbers = #tpu.dot_dimension_numbers<[1], [0], [0], [1], [0, 0, 1, 1], [], []>} : vector<8x8xf32>, vector<8x128xf32>, vector<8x128xf32> -> vector<8x128xf32>
    %9 = arith.addf %8, %2 : vector<8x128xf32>
    %cst_8 = arith.constant 0.000000e+00 : f32
    %10 = vector.broadcast %cst_8 : f32 to vector<8x128xf32>
    %11 = arith.maximumf %9, %10 : vector<8x128xf32>
    %c0_9 = arith.constant 0 : index
    %c384 = arith.constant 384 : index
    %12 = vector.load %arg2[%c0_9, %c384] : memref<128x768xf32, #tpu.memory_space<vmem>>, vector<128x128xf32>
    %cst_10 = arith.constant dense<0.000000e+00> : vector<8x128xf32>
    %13 = tpu.matmul %11, %12, %cst_10 {dimension_numbers = #tpu.dot_dimension_numbers<[1], [0], [0], [1], [0, 0, 1, 1], [], []>} : vector<8x128xf32>, vector<128x128xf32>, vector<8x128xf32> -> vector<8x128xf32>
    %14 = arith.addf %13, %3 : vector<8x128xf32>
    %cst_11 = arith.constant 0.000000e+00 : f32
    %15 = vector.broadcast %cst_11 : f32 to vector<8x128xf32>
    %16 = arith.maximumf %14, %15 : vector<8x128xf32>
    %c0_12 = arith.constant 0 : index
    %c0_13 = arith.constant 0 : index
    %17 = vector.load %arg0[%c0_12, %c0_13] : memref<64x8xf32, #tpu.memory_space<vmem>>, vector<64x8xf32>
    %c0_14 = arith.constant 0 : index
    %c0_15 = arith.constant 0 : index
    %18 = vector.load %arg3[%c0_14, %c0_15] : memref<64x128xf32, #tpu.memory_space<vmem>>, vector<8x128xf32>
    %cst_16 = arith.constant dense<0.000000e+00> : vector<64x128xf32>
    %19 = tpu.matmul %17, %18, %cst_16 {dimension_numbers = #tpu.dot_dimension_numbers<[1], [0], [0], [1], [0, 0, 1, 1], [], []>} : vector<64x8xf32>, vector<8x128xf32>, vector<64x128xf32> -> vector<64x128xf32>
    %20 = tpu.iota {dimensions = array<i32: 1>} : vector<8x128xi32>
    %c64_i32 = arith.constant 64 : i32
    %21 = vector.broadcast %c64_i32 : i32 to vector<8x128xi32>
    %22 = arith.cmpi sge, %20, %21 : vector<8x128xi32>
    %c96_i32 = arith.constant 96 : i32
    %23 = vector.broadcast %c96_i32 : i32 to vector<8x128xi32>
    %24 = arith.cmpi slt, %20, %23 : vector<8x128xi32>
    %25 = arith.andi %22, %24 : vector<8x128xi1>
    %c32_i32 = arith.constant 32 : i32
    %26 = vector.broadcast %c32_i32 : i32 to vector<8x128xi32>
    %27 = arith.cmpi slt, %20, %26 : vector<8x128xi32>
    %cst_17 = arith.constant 0.000000e+00 : f32
    %28 = vector.broadcast %cst_17 : f32 to vector<8x128xf32>
    %c32_i32_18 = arith.constant 32 : i32
    %29 = tpu.dynamic_rotate %28 by %c32_i32_18 dim 1 : vector<8x128xf32>, i32 -> vector<8x128xf32>
    %30 = arith.select %27, %28, %29 : vector<8x128xi1>, vector<8x128xf32>
    %c0_19 = arith.constant 0 : index
    %c0_20 = arith.constant 0 : index
    %31 = vector.load %arg2[%c0_19, %c0_20] : memref<128x768xf32, #tpu.memory_space<vmem>>, vector<128x256xf32>
    %cst_21 = arith.constant dense<0.000000e+00> : vector<8x256xf32>
    %32 = tpu.matmul %30, %31, %cst_21 {dimension_numbers = #tpu.dot_dimension_numbers<[1], [0], [0], [1], [0, 0, 1, 1], [], []>} : vector<8x128xf32>, vector<128x256xf32>, vector<8x256xf32> -> vector<8x256xf32>
    %33 = vector.extract_strided_slice %19 {offsets = [0, 0], sizes = [8, 128], strides = [1, 1]} : vector<64x128xf32> to vector<8x128xf32>
    %34 = arith.addf %33, %0 : vector<8x128xf32>
    %35 = vector.extract_strided_slice %32 {offsets = [0, 0], sizes = [8, 128], strides = [1, 1]} : vector<8x256xf32> to vector<8x128xf32>
    %36 = arith.addf %34, %35 : vector<8x128xf32>
    %37 = math.tanh %36 : vector<8x128xf32>
    %cst_22 = arith.constant 5.000000e-01 : f32
    %38 = vector.broadcast %cst_22 : f32 to vector<8x128xf32>
    %39 = arith.mulf %38, %37 : vector<8x128xf32>
    %cst_23 = arith.constant 5.000000e-01 : f32
    %40 = vector.broadcast %cst_23 : f32 to vector<8x128xf32>
    %41 = arith.addf %39, %40 : vector<8x128xf32>
    %42 = arith.select %25, %37, %41 : vector<8x128xi1>, vector<8x128xf32>
    %c96_i32_24 = arith.constant 96 : i32
    %43 = tpu.dynamic_rotate %42 by %c96_i32_24 dim 1 : vector<8x128xf32>, i32 -> vector<8x128xf32>
    %c64_i32_25 = arith.constant 64 : i32
    %44 = tpu.dynamic_rotate %42 by %c64_i32_25 dim 1 : vector<8x128xf32>, i32 -> vector<8x128xf32>
    %c32_i32_26 = arith.constant 32 : i32
    %45 = tpu.dynamic_rotate %42 by %c32_i32_26 dim 1 : vector<8x128xf32>, i32 -> vector<8x128xf32>
    %46 = arith.mulf %43, %28 : vector<8x128xf32>
    %47 = arith.mulf %42, %44 : vector<8x128xf32>
    %48 = arith.addf %46, %47 : vector<8x128xf32>
    %49 = math.tanh %48 : vector<8x128xf32>
    %50 = arith.mulf %45, %49 : vector<8x128xf32>
    %51 = vector.extract_strided_slice %32 {offsets = [0, 128], sizes = [8, 128], strides = [1, 1]} : vector<8x256xf32> to vector<8x128xf32>
    %c0_27 = arith.constant 0 : index
    %c256 = arith.constant 256 : index
    %52 = vector.load %arg2[%c0_27, %c256] : memref<128x768xf32, #tpu.memory_space<vmem>>, vector<128x128xf32>
    %cst_28 = arith.constant dense<0.000000e+00> : vector<8x128xf32>
    %53 = tpu.matmul %50, %52, %cst_28 {dimension_numbers = #tpu.dot_dimension_numbers<[1], [0], [0], [1], [0, 0, 1, 1], [], []>} : vector<8x128xf32>, vector<128x128xf32>, vector<8x128xf32> -> vector<8x128xf32>
    %54 = arith.addf %51, %53 : vector<8x128xf32>
    %55 = arith.addf %54, %1 : vector<8x128xf32>
    %56 = math.tanh %55 : vector<8x128xf32>
    %cst_29 = arith.constant 5.000000e-01 : f32
    %57 = vector.broadcast %cst_29 : f32 to vector<8x128xf32>
    %58 = arith.mulf %57, %56 : vector<8x128xf32>
    %cst_30 = arith.constant 5.000000e-01 : f32
    %59 = vector.broadcast %cst_30 : f32 to vector<8x128xf32>
    %60 = arith.addf %58, %59 : vector<8x128xf32>
    %61 = arith.select %25, %56, %60 : vector<8x128xi1>, vector<8x128xf32>
    %c96_i32_31 = arith.constant 96 : i32
    %62 = tpu.dynamic_rotate %61 by %c96_i32_31 dim 1 : vector<8x128xf32>, i32 -> vector<8x128xf32>
    %c64_i32_32 = arith.constant 64 : i32
    %63 = tpu.dynamic_rotate %61 by %c64_i32_32 dim 1 : vector<8x128xf32>, i32 -> vector<8x128xf32>
    %c32_i32_33 = arith.constant 32 : i32
    %64 = tpu.dynamic_rotate %61 by %c32_i32_33 dim 1 : vector<8x128xf32>, i32 -> vector<8x128xf32>
    %65 = arith.mulf %62, %28 : vector<8x128xf32>
    %66 = arith.mulf %61, %63 : vector<8x128xf32>
    %67 = arith.addf %65, %66 : vector<8x128xf32>
    %68 = math.tanh %67 : vector<8x128xf32>
    %69 = arith.mulf %64, %68 : vector<8x128xf32>
    %c32_i32_34 = arith.constant 32 : i32
    %70 = tpu.dynamic_rotate %69 by %c32_i32_34 dim 1 : vector<8x128xf32>, i32 -> vector<8x128xf32>
    %71 = arith.select %27, %50, %70 : vector<8x128xi1>, vector<8x128xf32>
    %c0_35 = arith.constant 0 : index
    %c0_36 = arith.constant 0 : index
    %72 = vector.load %arg2[%c0_35, %c0_36] : memref<128x768xf32, #tpu.memory_space<vmem>>, vector<128x256xf32>
    %cst_37 = arith.constant dense<0.000000e+00> : vector<8x256xf32>
    %73 = tpu.matmul %71, %72, %cst_37 {dimension_numbers = #tpu.dot_dimension_numbers<[1], [0], [0], [1], [0, 0, 1, 1], [], []>} : vector<8x128xf32>, vector<128x256xf32>, vector<8x256xf32> -> vector<8x256xf32>
    %74 = vector.extract_strided_slice %19 {offsets = [8, 0], sizes = [8, 128], strides = [1, 1]} : vector<64x128xf32> to vector<8x128xf32>
    %75 = arith.addf %74, %0 : vector<8x128xf32>
    %76 = vector.extract_strided_slice %73 {offsets = [0, 0], sizes = [8, 128], strides = [1, 1]} : vector<8x256xf32> to vector<8x128xf32>
    %77 = arith.addf %75, %76 : vector<8x128xf32>
    %78 = math.tanh %77 : vector<8x128xf32>
    %cst_38 = arith.constant 5.000000e-01 : f32
    %79 = vector.broadcast %cst_38 : f32 to vector<8x128xf32>
    %80 = arith.mulf %79, %78 : vector<8x128xf32>
    %cst_39 = arith.constant 5.000000e-01 : f32
    %81 = vector.broadcast %cst_39 : f32 to vector<8x128xf32>
    %82 = arith.addf %80, %81 : vector<8x128xf32>
    %83 = arith.select %25, %78, %82 : vector<8x128xi1>, vector<8x128xf32>
    %c96_i32_40 = arith.constant 96 : i32
    %84 = tpu.dynamic_rotate %83 by %c96_i32_40 dim 1 : vector<8x128xf32>, i32 -> vector<8x128xf32>
    %c64_i32_41 = arith.constant 64 : i32
    %85 = tpu.dynamic_rotate %83 by %c64_i32_41 dim 1 : vector<8x128xf32>, i32 -> vector<8x128xf32>
    %c32_i32_42 = arith.constant 32 : i32
    %86 = tpu.dynamic_rotate %83 by %c32_i32_42 dim 1 : vector<8x128xf32>, i32 -> vector<8x128xf32>
    %87 = arith.mulf %84, %48 : vector<8x128xf32>
    %88 = arith.mulf %83, %85 : vector<8x128xf32>
    %89 = arith.addf %87, %88 : vector<8x128xf32>
    %90 = math.tanh %89 : vector<8x128xf32>
    %91 = arith.mulf %86, %90 : vector<8x128xf32>
    %92 = vector.extract_strided_slice %73 {offsets = [0, 128], sizes = [8, 128], strides = [1, 1]} : vector<8x256xf32> to vector<8x128xf32>
    %c0_43 = arith.constant 0 : index
    %c256_44 = arith.constant 256 : index
    %93 = vector.load %arg2[%c0_43, %c256_44] : memref<128x768xf32, #tpu.memory_space<vmem>>, vector<128x128xf32>
    %cst_45 = arith.constant dense<0.000000e+00> : vector<8x128xf32>
    %94 = tpu.matmul %91, %93, %cst_45 {dimension_numbers = #tpu.dot_dimension_numbers<[1], [0], [0], [1], [0, 0, 1, 1], [], []>} : vector<8x128xf32>, vector<128x128xf32>, vector<8x128xf32> -> vector<8x128xf32>
    %95 = arith.addf %92, %94 : vector<8x128xf32>
    %96 = arith.addf %95, %1 : vector<8x128xf32>
    %97 = math.tanh %96 : vector<8x128xf32>
    %cst_46 = arith.constant 5.000000e-01 : f32
    %98 = vector.broadcast %cst_46 : f32 to vector<8x128xf32>
    %99 = arith.mulf %98, %97 : vector<8x128xf32>
    %cst_47 = arith.constant 5.000000e-01 : f32
    %100 = vector.broadcast %cst_47 : f32 to vector<8x128xf32>
    %101 = arith.addf %99, %100 : vector<8x128xf32>
    %102 = arith.select %25, %97, %101 : vector<8x128xi1>, vector<8x128xf32>
    %c96_i32_48 = arith.constant 96 : i32
    %103 = tpu.dynamic_rotate %102 by %c96_i32_48 dim 1 : vector<8x128xf32>, i32 -> vector<8x128xf32>
    %c64_i32_49 = arith.constant 64 : i32
    %104 = tpu.dynamic_rotate %102 by %c64_i32_49 dim 1 : vector<8x128xf32>, i32 -> vector<8x128xf32>
    %c32_i32_50 = arith.constant 32 : i32
    %105 = tpu.dynamic_rotate %102 by %c32_i32_50 dim 1 : vector<8x128xf32>, i32 -> vector<8x128xf32>
    %106 = arith.mulf %103, %67 : vector<8x128xf32>
    %107 = arith.mulf %102, %104 : vector<8x128xf32>
    %108 = arith.addf %106, %107 : vector<8x128xf32>
    %109 = math.tanh %108 : vector<8x128xf32>
    %110 = arith.mulf %105, %109 : vector<8x128xf32>
    %c32_i32_51 = arith.constant 32 : i32
    %111 = tpu.dynamic_rotate %110 by %c32_i32_51 dim 1 : vector<8x128xf32>, i32 -> vector<8x128xf32>
    %112 = arith.select %27, %91, %111 : vector<8x128xi1>, vector<8x128xf32>
    %c0_52 = arith.constant 0 : index
    %c0_53 = arith.constant 0 : index
    %113 = vector.load %arg2[%c0_52, %c0_53] : memref<128x768xf32, #tpu.memory_space<vmem>>, vector<128x256xf32>
    %cst_54 = arith.constant dense<0.000000e+00> : vector<8x256xf32>
    %114 = tpu.matmul %112, %113, %cst_54 {dimension_numbers = #tpu.dot_dimension_numbers<[1], [0], [0], [1], [0, 0, 1, 1], [], []>} : vector<8x128xf32>, vector<128x256xf32>, vector<8x256xf32> -> vector<8x256xf32>
    %115 = vector.extract_strided_slice %19 {offsets = [16, 0], sizes = [8, 128], strides = [1, 1]} : vector<64x128xf32> to vector<8x128xf32>
    %116 = arith.addf %115, %0 : vector<8x128xf32>
    %117 = vector.extract_strided_slice %114 {offsets = [0, 0], sizes = [8, 128], strides = [1, 1]} : vector<8x256xf32> to vector<8x128xf32>
    %118 = arith.addf %116, %117 : vector<8x128xf32>
    %119 = math.tanh %118 : vector<8x128xf32>
    %cst_55 = arith.constant 5.000000e-01 : f32
    %120 = vector.broadcast %cst_55 : f32 to vector<8x128xf32>
    %121 = arith.mulf %120, %119 : vector<8x128xf32>
    %cst_56 = arith.constant 5.000000e-01 : f32
    %122 = vector.broadcast %cst_56 : f32 to vector<8x128xf32>
    %123 = arith.addf %121, %122 : vector<8x128xf32>
    %124 = arith.select %25, %119, %123 : vector<8x128xi1>, vector<8x128xf32>
    %c96_i32_57 = arith.constant 96 : i32
    %125 = tpu.dynamic_rotate %124 by %c96_i32_57 dim 1 : vector<8x128xf32>, i32 -> vector<8x128xf32>
    %c64_i32_58 = arith.constant 64 : i32
    %126 = tpu.dynamic_rotate %124 by %c64_i32_58 dim 1 : vector<8x128xf32>, i32 -> vector<8x128xf32>
    %c32_i32_59 = arith.constant 32 : i32
    %127 = tpu.dynamic_rotate %124 by %c32_i32_59 dim 1 : vector<8x128xf32>, i32 -> vector<8x128xf32>
    %128 = arith.mulf %125, %89 : vector<8x128xf32>
    %129 = arith.mulf %124, %126 : vector<8x128xf32>
    %130 = arith.addf %128, %129 : vector<8x128xf32>
    %131 = math.tanh %130 : vector<8x128xf32>
    %132 = arith.mulf %127, %131 : vector<8x128xf32>
    %133 = vector.extract_strided_slice %114 {offsets = [0, 128], sizes = [8, 128], strides = [1, 1]} : vector<8x256xf32> to vector<8x128xf32>
    %c0_60 = arith.constant 0 : index
    %c256_61 = arith.constant 256 : index
    %134 = vector.load %arg2[%c0_60, %c256_61] : memref<128x768xf32, #tpu.memory_space<vmem>>, vector<128x128xf32>
    %cst_62 = arith.constant dense<0.000000e+00> : vector<8x128xf32>
    %135 = tpu.matmul %132, %134, %cst_62 {dimension_numbers = #tpu.dot_dimension_numbers<[1], [0], [0], [1], [0, 0, 1, 1], [], []>} : vector<8x128xf32>, vector<128x128xf32>, vector<8x128xf32> -> vector<8x128xf32>
    %136 = arith.addf %133, %135 : vector<8x128xf32>
    %137 = arith.addf %136, %1 : vector<8x128xf32>
    %138 = math.tanh %137 : vector<8x128xf32>
    %cst_63 = arith.constant 5.000000e-01 : f32
    %139 = vector.broadcast %cst_63 : f32 to vector<8x128xf32>
    %140 = arith.mulf %139, %138 : vector<8x128xf32>
    %cst_64 = arith.constant 5.000000e-01 : f32
    %141 = vector.broadcast %cst_64 : f32 to vector<8x128xf32>
    %142 = arith.addf %140, %141 : vector<8x128xf32>
    %143 = arith.select %25, %138, %142 : vector<8x128xi1>, vector<8x128xf32>
    %c96_i32_65 = arith.constant 96 : i32
    %144 = tpu.dynamic_rotate %143 by %c96_i32_65 dim 1 : vector<8x128xf32>, i32 -> vector<8x128xf32>
    %c64_i32_66 = arith.constant 64 : i32
    %145 = tpu.dynamic_rotate %143 by %c64_i32_66 dim 1 : vector<8x128xf32>, i32 -> vector<8x128xf32>
    %c32_i32_67 = arith.constant 32 : i32
    %146 = tpu.dynamic_rotate %143 by %c32_i32_67 dim 1 : vector<8x128xf32>, i32 -> vector<8x128xf32>
    %147 = arith.mulf %144, %108 : vector<8x128xf32>
    %148 = arith.mulf %143, %145 : vector<8x128xf32>
    %149 = arith.addf %147, %148 : vector<8x128xf32>
    %150 = math.tanh %149 : vector<8x128xf32>
    %151 = arith.mulf %146, %150 : vector<8x128xf32>
    %c32_i32_68 = arith.constant 32 : i32
    %152 = tpu.dynamic_rotate %151 by %c32_i32_68 dim 1 : vector<8x128xf32>, i32 -> vector<8x128xf32>
    %153 = arith.select %27, %132, %152 : vector<8x128xi1>, vector<8x128xf32>
    %c0_69 = arith.constant 0 : index
    %c0_70 = arith.constant 0 : index
    %154 = vector.load %arg2[%c0_69, %c0_70] : memref<128x768xf32, #tpu.memory_space<vmem>>, vector<128x256xf32>
    %cst_71 = arith.constant dense<0.000000e+00> : vector<8x256xf32>
    %155 = tpu.matmul %153, %154, %cst_71 {dimension_numbers = #tpu.dot_dimension_numbers<[1], [0], [0], [1], [0, 0, 1, 1], [], []>} : vector<8x128xf32>, vector<128x256xf32>, vector<8x256xf32> -> vector<8x256xf32>
    %156 = vector.extract_strided_slice %19 {offsets = [24, 0], sizes = [8, 128], strides = [1, 1]} : vector<64x128xf32> to vector<8x128xf32>
    %157 = arith.addf %156, %0 : vector<8x128xf32>
    %158 = vector.extract_strided_slice %155 {offsets = [0, 0], sizes = [8, 128], strides = [1, 1]} : vector<8x256xf32> to vector<8x128xf32>
    %159 = arith.addf %157, %158 : vector<8x128xf32>
    %160 = math.tanh %159 : vector<8x128xf32>
    %cst_72 = arith.constant 5.000000e-01 : f32
    %161 = vector.broadcast %cst_72 : f32 to vector<8x128xf32>
    %162 = arith.mulf %161, %160 : vector<8x128xf32>
    %cst_73 = arith.constant 5.000000e-01 : f32
    %163 = vector.broadcast %cst_73 : f32 to vector<8x128xf32>
    %164 = arith.addf %162, %163 : vector<8x128xf32>
    %165 = arith.select %25, %160, %164 : vector<8x128xi1>, vector<8x128xf32>
    %c96_i32_74 = arith.constant 96 : i32
    %166 = tpu.dynamic_rotate %165 by %c96_i32_74 dim 1 : vector<8x128xf32>, i32 -> vector<8x128xf32>
    %c64_i32_75 = arith.constant 64 : i32
    %167 = tpu.dynamic_rotate %165 by %c64_i32_75 dim 1 : vector<8x128xf32>, i32 -> vector<8x128xf32>
    %c32_i32_76 = arith.constant 32 : i32
    %168 = tpu.dynamic_rotate %165 by %c32_i32_76 dim 1 : vector<8x128xf32>, i32 -> vector<8x128xf32>
    %169 = arith.mulf %166, %130 : vector<8x128xf32>
    %170 = arith.mulf %165, %167 : vector<8x128xf32>
    %171 = arith.addf %169, %170 : vector<8x128xf32>
    %172 = math.tanh %171 : vector<8x128xf32>
    %173 = arith.mulf %168, %172 : vector<8x128xf32>
    %174 = vector.extract_strided_slice %155 {offsets = [0, 128], sizes = [8, 128], strides = [1, 1]} : vector<8x256xf32> to vector<8x128xf32>
    %c0_77 = arith.constant 0 : index
    %c256_78 = arith.constant 256 : index
    %175 = vector.load %arg2[%c0_77, %c256_78] : memref<128x768xf32, #tpu.memory_space<vmem>>, vector<128x128xf32>
    %cst_79 = arith.constant dense<0.000000e+00> : vector<8x128xf32>
    %176 = tpu.matmul %173, %175, %cst_79 {dimension_numbers = #tpu.dot_dimension_numbers<[1], [0], [0], [1], [0, 0, 1, 1], [], []>} : vector<8x128xf32>, vector<128x128xf32>, vector<8x128xf32> -> vector<8x128xf32>
    %177 = arith.addf %174, %176 : vector<8x128xf32>
    %178 = arith.addf %177, %1 : vector<8x128xf32>
    %179 = math.tanh %178 : vector<8x128xf32>
    %cst_80 = arith.constant 5.000000e-01 : f32
    %180 = vector.broadcast %cst_80 : f32 to vector<8x128xf32>
    %181 = arith.mulf %180, %179 : vector<8x128xf32>
    %cst_81 = arith.constant 5.000000e-01 : f32
    %182 = vector.broadcast %cst_81 : f32 to vector<8x128xf32>
    %183 = arith.addf %181, %182 : vector<8x128xf32>
    %184 = arith.select %25, %179, %183 : vector<8x128xi1>, vector<8x128xf32>
    %c96_i32_82 = arith.constant 96 : i32
    %185 = tpu.dynamic_rotate %184 by %c96_i32_82 dim 1 : vector<8x128xf32>, i32 -> vector<8x128xf32>
    %c64_i32_83 = arith.constant 64 : i32
    %186 = tpu.dynamic_rotate %184 by %c64_i32_83 dim 1 : vector<8x128xf32>, i32 -> vector<8x128xf32>
    %c32_i32_84 = arith.constant 32 : i32
    %187 = tpu.dynamic_rotate %184 by %c32_i32_84 dim 1 : vector<8x128xf32>, i32 -> vector<8x128xf32>
    %188 = arith.mulf %185, %149 : vector<8x128xf32>
    %189 = arith.mulf %184, %186 : vector<8x128xf32>
    %190 = arith.addf %188, %189 : vector<8x128xf32>
    %191 = math.tanh %190 : vector<8x128xf32>
    %192 = arith.mulf %187, %191 : vector<8x128xf32>
    %c32_i32_85 = arith.constant 32 : i32
    %193 = tpu.dynamic_rotate %192 by %c32_i32_85 dim 1 : vector<8x128xf32>, i32 -> vector<8x128xf32>
    %194 = arith.select %27, %173, %193 : vector<8x128xi1>, vector<8x128xf32>
    %c0_86 = arith.constant 0 : index
    %c0_87 = arith.constant 0 : index
    %195 = vector.load %arg2[%c0_86, %c0_87] : memref<128x768xf32, #tpu.memory_space<vmem>>, vector<128x256xf32>
    %cst_88 = arith.constant dense<0.000000e+00> : vector<8x256xf32>
    %196 = tpu.matmul %194, %195, %cst_88 {dimension_numbers = #tpu.dot_dimension_numbers<[1], [0], [0], [1], [0, 0, 1, 1], [], []>} : vector<8x128xf32>, vector<128x256xf32>, vector<8x256xf32> -> vector<8x256xf32>
    %197 = vector.extract_strided_slice %19 {offsets = [32, 0], sizes = [8, 128], strides = [1, 1]} : vector<64x128xf32> to vector<8x128xf32>
    %198 = arith.addf %197, %0 : vector<8x128xf32>
    %199 = vector.extract_strided_slice %196 {offsets = [0, 0], sizes = [8, 128], strides = [1, 1]} : vector<8x256xf32> to vector<8x128xf32>
    %200 = arith.addf %198, %199 : vector<8x128xf32>
    %201 = math.tanh %200 : vector<8x128xf32>
    %cst_89 = arith.constant 5.000000e-01 : f32
    %202 = vector.broadcast %cst_89 : f32 to vector<8x128xf32>
    %203 = arith.mulf %202, %201 : vector<8x128xf32>
    %cst_90 = arith.constant 5.000000e-01 : f32
    %204 = vector.broadcast %cst_90 : f32 to vector<8x128xf32>
    %205 = arith.addf %203, %204 : vector<8x128xf32>
    %206 = arith.select %25, %201, %205 : vector<8x128xi1>, vector<8x128xf32>
    %c96_i32_91 = arith.constant 96 : i32
    %207 = tpu.dynamic_rotate %206 by %c96_i32_91 dim 1 : vector<8x128xf32>, i32 -> vector<8x128xf32>
    %c64_i32_92 = arith.constant 64 : i32
    %208 = tpu.dynamic_rotate %206 by %c64_i32_92 dim 1 : vector<8x128xf32>, i32 -> vector<8x128xf32>
    %c32_i32_93 = arith.constant 32 : i32
    %209 = tpu.dynamic_rotate %206 by %c32_i32_93 dim 1 : vector<8x128xf32>, i32 -> vector<8x128xf32>
    %210 = arith.mulf %207, %171 : vector<8x128xf32>
    %211 = arith.mulf %206, %208 : vector<8x128xf32>
    %212 = arith.addf %210, %211 : vector<8x128xf32>
    %213 = math.tanh %212 : vector<8x128xf32>
    %214 = arith.mulf %209, %213 : vector<8x128xf32>
    %215 = vector.extract_strided_slice %196 {offsets = [0, 128], sizes = [8, 128], strides = [1, 1]} : vector<8x256xf32> to vector<8x128xf32>
    %c0_94 = arith.constant 0 : index
    %c256_95 = arith.constant 256 : index
    %216 = vector.load %arg2[%c0_94, %c256_95] : memref<128x768xf32, #tpu.memory_space<vmem>>, vector<128x128xf32>
    %cst_96 = arith.constant dense<0.000000e+00> : vector<8x128xf32>
    %217 = tpu.matmul %214, %216, %cst_96 {dimension_numbers = #tpu.dot_dimension_numbers<[1], [0], [0], [1], [0, 0, 1, 1], [], []>} : vector<8x128xf32>, vector<128x128xf32>, vector<8x128xf32> -> vector<8x128xf32>
    %218 = arith.addf %215, %217 : vector<8x128xf32>
    %219 = arith.addf %218, %1 : vector<8x128xf32>
    %220 = math.tanh %219 : vector<8x128xf32>
    %cst_97 = arith.constant 5.000000e-01 : f32
    %221 = vector.broadcast %cst_97 : f32 to vector<8x128xf32>
    %222 = arith.mulf %221, %220 : vector<8x128xf32>
    %cst_98 = arith.constant 5.000000e-01 : f32
    %223 = vector.broadcast %cst_98 : f32 to vector<8x128xf32>
    %224 = arith.addf %222, %223 : vector<8x128xf32>
    %225 = arith.select %25, %220, %224 : vector<8x128xi1>, vector<8x128xf32>
    %c96_i32_99 = arith.constant 96 : i32
    %226 = tpu.dynamic_rotate %225 by %c96_i32_99 dim 1 : vector<8x128xf32>, i32 -> vector<8x128xf32>
    %c64_i32_100 = arith.constant 64 : i32
    %227 = tpu.dynamic_rotate %225 by %c64_i32_100 dim 1 : vector<8x128xf32>, i32 -> vector<8x128xf32>
    %c32_i32_101 = arith.constant 32 : i32
    %228 = tpu.dynamic_rotate %225 by %c32_i32_101 dim 1 : vector<8x128xf32>, i32 -> vector<8x128xf32>
    %229 = arith.mulf %226, %190 : vector<8x128xf32>
    %230 = arith.mulf %225, %227 : vector<8x128xf32>
    %231 = arith.addf %229, %230 : vector<8x128xf32>
    %232 = math.tanh %231 : vector<8x128xf32>
    %233 = arith.mulf %228, %232 : vector<8x128xf32>
    %c32_i32_102 = arith.constant 32 : i32
    %234 = tpu.dynamic_rotate %233 by %c32_i32_102 dim 1 : vector<8x128xf32>, i32 -> vector<8x128xf32>
    %235 = arith.select %27, %214, %234 : vector<8x128xi1>, vector<8x128xf32>
    %c0_103 = arith.constant 0 : index
    %c0_104 = arith.constant 0 : index
    %236 = vector.load %arg2[%c0_103, %c0_104] : memref<128x768xf32, #tpu.memory_space<vmem>>, vector<128x256xf32>
    %cst_105 = arith.constant dense<0.000000e+00> : vector<8x256xf32>
    %237 = tpu.matmul %235, %236, %cst_105 {dimension_numbers = #tpu.dot_dimension_numbers<[1], [0], [0], [1], [0, 0, 1, 1], [], []>} : vector<8x128xf32>, vector<128x256xf32>, vector<8x256xf32> -> vector<8x256xf32>
    %238 = vector.extract_strided_slice %19 {offsets = [40, 0], sizes = [8, 128], strides = [1, 1]} : vector<64x128xf32> to vector<8x128xf32>
    %239 = arith.addf %238, %0 : vector<8x128xf32>
    %240 = vector.extract_strided_slice %237 {offsets = [0, 0], sizes = [8, 128], strides = [1, 1]} : vector<8x256xf32> to vector<8x128xf32>
    %241 = arith.addf %239, %240 : vector<8x128xf32>
    %242 = math.tanh %241 : vector<8x128xf32>
    %cst_106 = arith.constant 5.000000e-01 : f32
    %243 = vector.broadcast %cst_106 : f32 to vector<8x128xf32>
    %244 = arith.mulf %243, %242 : vector<8x128xf32>
    %cst_107 = arith.constant 5.000000e-01 : f32
    %245 = vector.broadcast %cst_107 : f32 to vector<8x128xf32>
    %246 = arith.addf %244, %245 : vector<8x128xf32>
    %247 = arith.select %25, %242, %246 : vector<8x128xi1>, vector<8x128xf32>
    %c96_i32_108 = arith.constant 96 : i32
    %248 = tpu.dynamic_rotate %247 by %c96_i32_108 dim 1 : vector<8x128xf32>, i32 -> vector<8x128xf32>
    %c64_i32_109 = arith.constant 64 : i32
    %249 = tpu.dynamic_rotate %247 by %c64_i32_109 dim 1 : vector<8x128xf32>, i32 -> vector<8x128xf32>
    %c32_i32_110 = arith.constant 32 : i32
    %250 = tpu.dynamic_rotate %247 by %c32_i32_110 dim 1 : vector<8x128xf32>, i32 -> vector<8x128xf32>
    %251 = arith.mulf %248, %212 : vector<8x128xf32>
    %252 = arith.mulf %247, %249 : vector<8x128xf32>
    %253 = arith.addf %251, %252 : vector<8x128xf32>
    %254 = math.tanh %253 : vector<8x128xf32>
    %255 = arith.mulf %250, %254 : vector<8x128xf32>
    %256 = vector.extract_strided_slice %237 {offsets = [0, 128], sizes = [8, 128], strides = [1, 1]} : vector<8x256xf32> to vector<8x128xf32>
    %c0_111 = arith.constant 0 : index
    %c256_112 = arith.constant 256 : index
    %257 = vector.load %arg2[%c0_111, %c256_112] : memref<128x768xf32, #tpu.memory_space<vmem>>, vector<128x128xf32>
    %cst_113 = arith.constant dense<0.000000e+00> : vector<8x128xf32>
    %258 = tpu.matmul %255, %257, %cst_113 {dimension_numbers = #tpu.dot_dimension_numbers<[1], [0], [0], [1], [0, 0, 1, 1], [], []>} : vector<8x128xf32>, vector<128x128xf32>, vector<8x128xf32> -> vector<8x128xf32>
    %259 = arith.addf %256, %258 : vector<8x128xf32>
    %260 = arith.addf %259, %1 : vector<8x128xf32>
    %261 = math.tanh %260 : vector<8x128xf32>
    %cst_114 = arith.constant 5.000000e-01 : f32
    %262 = vector.broadcast %cst_114 : f32 to vector<8x128xf32>
    %263 = arith.mulf %262, %261 : vector<8x128xf32>
    %cst_115 = arith.constant 5.000000e-01 : f32
    %264 = vector.broadcast %cst_115 : f32 to vector<8x128xf32>
    %265 = arith.addf %263, %264 : vector<8x128xf32>
    %266 = arith.select %25, %261, %265 : vector<8x128xi1>, vector<8x128xf32>
    %c96_i32_116 = arith.constant 96 : i32
    %267 = tpu.dynamic_rotate %266 by %c96_i32_116 dim 1 : vector<8x128xf32>, i32 -> vector<8x128xf32>
    %c64_i32_117 = arith.constant 64 : i32
    %268 = tpu.dynamic_rotate %266 by %c64_i32_117 dim 1 : vector<8x128xf32>, i32 -> vector<8x128xf32>
    %c32_i32_118 = arith.constant 32 : i32
    %269 = tpu.dynamic_rotate %266 by %c32_i32_118 dim 1 : vector<8x128xf32>, i32 -> vector<8x128xf32>
    %270 = arith.mulf %267, %231 : vector<8x128xf32>
    %271 = arith.mulf %266, %268 : vector<8x128xf32>
    %272 = arith.addf %270, %271 : vector<8x128xf32>
    %273 = math.tanh %272 : vector<8x128xf32>
    %274 = arith.mulf %269, %273 : vector<8x128xf32>
    %c32_i32_119 = arith.constant 32 : i32
    %275 = tpu.dynamic_rotate %274 by %c32_i32_119 dim 1 : vector<8x128xf32>, i32 -> vector<8x128xf32>
    %276 = arith.select %27, %255, %275 : vector<8x128xi1>, vector<8x128xf32>
    %c0_120 = arith.constant 0 : index
    %c0_121 = arith.constant 0 : index
    %277 = vector.load %arg2[%c0_120, %c0_121] : memref<128x768xf32, #tpu.memory_space<vmem>>, vector<128x256xf32>
    %cst_122 = arith.constant dense<0.000000e+00> : vector<8x256xf32>
    %278 = tpu.matmul %276, %277, %cst_122 {dimension_numbers = #tpu.dot_dimension_numbers<[1], [0], [0], [1], [0, 0, 1, 1], [], []>} : vector<8x128xf32>, vector<128x256xf32>, vector<8x256xf32> -> vector<8x256xf32>
    %279 = vector.extract_strided_slice %19 {offsets = [48, 0], sizes = [8, 128], strides = [1, 1]} : vector<64x128xf32> to vector<8x128xf32>
    %280 = arith.addf %279, %0 : vector<8x128xf32>
    %281 = vector.extract_strided_slice %278 {offsets = [0, 0], sizes = [8, 128], strides = [1, 1]} : vector<8x256xf32> to vector<8x128xf32>
    %282 = arith.addf %280, %281 : vector<8x128xf32>
    %283 = math.tanh %282 : vector<8x128xf32>
    %cst_123 = arith.constant 5.000000e-01 : f32
    %284 = vector.broadcast %cst_123 : f32 to vector<8x128xf32>
    %285 = arith.mulf %284, %283 : vector<8x128xf32>
    %cst_124 = arith.constant 5.000000e-01 : f32
    %286 = vector.broadcast %cst_124 : f32 to vector<8x128xf32>
    %287 = arith.addf %285, %286 : vector<8x128xf32>
    %288 = arith.select %25, %283, %287 : vector<8x128xi1>, vector<8x128xf32>
    %c96_i32_125 = arith.constant 96 : i32
    %289 = tpu.dynamic_rotate %288 by %c96_i32_125 dim 1 : vector<8x128xf32>, i32 -> vector<8x128xf32>
    %c64_i32_126 = arith.constant 64 : i32
    %290 = tpu.dynamic_rotate %288 by %c64_i32_126 dim 1 : vector<8x128xf32>, i32 -> vector<8x128xf32>
    %c32_i32_127 = arith.constant 32 : i32
    %291 = tpu.dynamic_rotate %288 by %c32_i32_127 dim 1 : vector<8x128xf32>, i32 -> vector<8x128xf32>
    %292 = arith.mulf %289, %253 : vector<8x128xf32>
    %293 = arith.mulf %288, %290 : vector<8x128xf32>
    %294 = arith.addf %292, %293 : vector<8x128xf32>
    %295 = math.tanh %294 : vector<8x128xf32>
    %296 = arith.mulf %291, %295 : vector<8x128xf32>
    %297 = vector.extract_strided_slice %278 {offsets = [0, 128], sizes = [8, 128], strides = [1, 1]} : vector<8x256xf32> to vector<8x128xf32>
    %c0_128 = arith.constant 0 : index
    %c256_129 = arith.constant 256 : index
    %298 = vector.load %arg2[%c0_128, %c256_129] : memref<128x768xf32, #tpu.memory_space<vmem>>, vector<128x128xf32>
    %cst_130 = arith.constant dense<0.000000e+00> : vector<8x128xf32>
    %299 = tpu.matmul %296, %298, %cst_130 {dimension_numbers = #tpu.dot_dimension_numbers<[1], [0], [0], [1], [0, 0, 1, 1], [], []>} : vector<8x128xf32>, vector<128x128xf32>, vector<8x128xf32> -> vector<8x128xf32>
    %300 = arith.addf %297, %299 : vector<8x128xf32>
    %301 = arith.addf %300, %1 : vector<8x128xf32>
    %302 = math.tanh %301 : vector<8x128xf32>
    %cst_131 = arith.constant 5.000000e-01 : f32
    %303 = vector.broadcast %cst_131 : f32 to vector<8x128xf32>
    %304 = arith.mulf %303, %302 : vector<8x128xf32>
    %cst_132 = arith.constant 5.000000e-01 : f32
    %305 = vector.broadcast %cst_132 : f32 to vector<8x128xf32>
    %306 = arith.addf %304, %305 : vector<8x128xf32>
    %307 = arith.select %25, %302, %306 : vector<8x128xi1>, vector<8x128xf32>
    %c96_i32_133 = arith.constant 96 : i32
    %308 = tpu.dynamic_rotate %307 by %c96_i32_133 dim 1 : vector<8x128xf32>, i32 -> vector<8x128xf32>
    %c64_i32_134 = arith.constant 64 : i32
    %309 = tpu.dynamic_rotate %307 by %c64_i32_134 dim 1 : vector<8x128xf32>, i32 -> vector<8x128xf32>
    %c32_i32_135 = arith.constant 32 : i32
    %310 = tpu.dynamic_rotate %307 by %c32_i32_135 dim 1 : vector<8x128xf32>, i32 -> vector<8x128xf32>
    %311 = arith.mulf %308, %272 : vector<8x128xf32>
    %312 = arith.mulf %307, %309 : vector<8x128xf32>
    %313 = arith.addf %311, %312 : vector<8x128xf32>
    %314 = math.tanh %313 : vector<8x128xf32>
    %315 = arith.mulf %310, %314 : vector<8x128xf32>
    %c32_i32_136 = arith.constant 32 : i32
    %316 = tpu.dynamic_rotate %315 by %c32_i32_136 dim 1 : vector<8x128xf32>, i32 -> vector<8x128xf32>
    %317 = arith.select %27, %296, %316 : vector<8x128xi1>, vector<8x128xf32>
    %c0_137 = arith.constant 0 : index
    %c0_138 = arith.constant 0 : index
    %318 = vector.load %arg2[%c0_137, %c0_138] : memref<128x768xf32, #tpu.memory_space<vmem>>, vector<128x256xf32>
    %cst_139 = arith.constant dense<0.000000e+00> : vector<8x256xf32>
    %319 = tpu.matmul %317, %318, %cst_139 {dimension_numbers = #tpu.dot_dimension_numbers<[1], [0], [0], [1], [0, 0, 1, 1], [], []>} : vector<8x128xf32>, vector<128x256xf32>, vector<8x256xf32> -> vector<8x256xf32>
    %320 = vector.extract_strided_slice %19 {offsets = [56, 0], sizes = [8, 128], strides = [1, 1]} : vector<64x128xf32> to vector<8x128xf32>
    %321 = arith.addf %320, %0 : vector<8x128xf32>
    %322 = vector.extract_strided_slice %319 {offsets = [0, 0], sizes = [8, 128], strides = [1, 1]} : vector<8x256xf32> to vector<8x128xf32>
    %323 = arith.addf %321, %322 : vector<8x128xf32>
    %324 = math.tanh %323 : vector<8x128xf32>
    %cst_140 = arith.constant 5.000000e-01 : f32
    %325 = vector.broadcast %cst_140 : f32 to vector<8x128xf32>
    %326 = arith.mulf %325, %324 : vector<8x128xf32>
    %cst_141 = arith.constant 5.000000e-01 : f32
    %327 = vector.broadcast %cst_141 : f32 to vector<8x128xf32>
    %328 = arith.addf %326, %327 : vector<8x128xf32>
    %329 = arith.select %25, %324, %328 : vector<8x128xi1>, vector<8x128xf32>
    %c96_i32_142 = arith.constant 96 : i32
    %330 = tpu.dynamic_rotate %329 by %c96_i32_142 dim 1 : vector<8x128xf32>, i32 -> vector<8x128xf32>
    %c64_i32_143 = arith.constant 64 : i32
    %331 = tpu.dynamic_rotate %329 by %c64_i32_143 dim 1 : vector<8x128xf32>, i32 -> vector<8x128xf32>
    %c32_i32_144 = arith.constant 32 : i32
    %332 = tpu.dynamic_rotate %329 by %c32_i32_144 dim 1 : vector<8x128xf32>, i32 -> vector<8x128xf32>
    %333 = arith.mulf %330, %294 : vector<8x128xf32>
    %334 = arith.mulf %329, %331 : vector<8x128xf32>
    %335 = arith.addf %333, %334 : vector<8x128xf32>
    %336 = math.tanh %335 : vector<8x128xf32>
    %337 = arith.mulf %332, %336 : vector<8x128xf32>
    %338 = vector.extract_strided_slice %319 {offsets = [0, 128], sizes = [8, 128], strides = [1, 1]} : vector<8x256xf32> to vector<8x128xf32>
    %c0_145 = arith.constant 0 : index
    %c256_146 = arith.constant 256 : index
    %339 = vector.load %arg2[%c0_145, %c256_146] : memref<128x768xf32, #tpu.memory_space<vmem>>, vector<128x128xf32>
    %cst_147 = arith.constant dense<0.000000e+00> : vector<8x128xf32>
    %340 = tpu.matmul %337, %339, %cst_147 {dimension_numbers = #tpu.dot_dimension_numbers<[1], [0], [0], [1], [0, 0, 1, 1], [], []>} : vector<8x128xf32>, vector<128x128xf32>, vector<8x128xf32> -> vector<8x128xf32>
    %341 = arith.addf %338, %340 : vector<8x128xf32>
    %342 = arith.addf %341, %1 : vector<8x128xf32>
    %343 = math.tanh %342 : vector<8x128xf32>
    %cst_148 = arith.constant 5.000000e-01 : f32
    %344 = vector.broadcast %cst_148 : f32 to vector<8x128xf32>
    %345 = arith.mulf %344, %343 : vector<8x128xf32>
    %cst_149 = arith.constant 5.000000e-01 : f32
    %346 = vector.broadcast %cst_149 : f32 to vector<8x128xf32>
    %347 = arith.addf %345, %346 : vector<8x128xf32>
    %348 = arith.select %25, %343, %347 : vector<8x128xi1>, vector<8x128xf32>
    %c96_i32_150 = arith.constant 96 : i32
    %349 = tpu.dynamic_rotate %348 by %c96_i32_150 dim 1 : vector<8x128xf32>, i32 -> vector<8x128xf32>
    %c64_i32_151 = arith.constant 64 : i32
    %350 = tpu.dynamic_rotate %348 by %c64_i32_151 dim 1 : vector<8x128xf32>, i32 -> vector<8x128xf32>
    %c32_i32_152 = arith.constant 32 : i32
    %351 = tpu.dynamic_rotate %348 by %c32_i32_152 dim 1 : vector<8x128xf32>, i32 -> vector<8x128xf32>
    %352 = arith.mulf %349, %313 : vector<8x128xf32>
    %353 = arith.mulf %348, %350 : vector<8x128xf32>
    %354 = arith.addf %352, %353 : vector<8x128xf32>
    %355 = math.tanh %354 : vector<8x128xf32>
    %356 = arith.mulf %351, %355 : vector<8x128xf32>
    %cst_153 = arith.constant 0.000000e+00 : f32
    %357 = vector.broadcast %cst_153 : f32 to vector<8x128xf32>
    %358 = arith.select %27, %356, %357 : vector<8x128xi1>, vector<8x128xf32>
    %c32_i32_154 = arith.constant 32 : i32
    %359 = tpu.dynamic_rotate %16 by %c32_i32_154 dim 1 : vector<8x128xf32>, i32 -> vector<8x128xf32>
    %360 = arith.addf %358, %359 : vector<8x128xf32>
    %c0_155 = arith.constant 0 : index
    %c512 = arith.constant 512 : index
    %361 = vector.load %arg2[%c0_155, %c512] : memref<128x768xf32, #tpu.memory_space<vmem>>, vector<128x128xf32>
    %cst_156 = arith.constant dense<0.000000e+00> : vector<8x128xf32>
    %362 = tpu.matmul %360, %361, %cst_156 {dimension_numbers = #tpu.dot_dimension_numbers<[1], [0], [0], [1], [0, 0, 1, 1], [], []>} : vector<8x128xf32>, vector<128x128xf32>, vector<8x128xf32> -> vector<8x128xf32>
    %363 = arith.addf %362, %4 : vector<8x128xf32>
    %cst_157 = arith.constant 0.000000e+00 : f32
    %364 = vector.broadcast %cst_157 : f32 to vector<8x128xf32>
    %365 = arith.maximumf %363, %364 : vector<8x128xf32>
    %c0_158 = arith.constant 0 : index
    %c640 = arith.constant 640 : index
    %366 = vector.load %arg2[%c0_158, %c640] : memref<128x768xf32, #tpu.memory_space<vmem>>, vector<128x128xf32>
    %cst_159 = arith.constant dense<0.000000e+00> : vector<8x128xf32>
    %367 = tpu.matmul %365, %366, %cst_159 {dimension_numbers = #tpu.dot_dimension_numbers<[1], [0], [0], [1], [0, 0, 1, 1], [], []>} : vector<8x128xf32>, vector<128x128xf32>, vector<8x128xf32> -> vector<8x128xf32>
    %368 = arith.addf %367, %5 : vector<8x128xf32>
    %c0_160 = arith.constant 0 : index
    %c0_161 = arith.constant 0 : index
    %369 = vector.load %arg4[%c0_160, %c0_161] : memref<8x128xf32, #tpu.memory_space<vmem>>, vector<8x128xf32>
    tpu.vector_store %arg4[%c0_160, %c0_161], %368 {strides = array<i32>} : memref<8x128xf32, #tpu.memory_space<vmem>>, vector<8x128xf32>,
    return
  }
}

</mosaic_0001>

<bundles_post_ra>
// kernel: f1_prediction_forward.1
= control target key start
LH: loop header
LB: loop body
LE: loop exit
PB: predicated region body
PF: predicated region fallthrough
CT: control target
= control target key end

     0   :  { %9 = vsyncpa [#allocation3], 0  ;;  %s1248_s18 = smov [#allocation2]   ;;  %s1249_s20 = smov 768   ;;  %s2083_s0 = inlined_call_operand.vmem [shape: f32[64,8], index: 0, kind: input, shape index: {}]   ;;  %s2084_s1 = inlined_call_operand.vmem [shape: f32[8,8], index: 1, kind: input, shape index: {}]   ;;  %s2085_s2 = inlined_call_operand.hbm [shape: f32[128,768], index: 2, kind: input, shape index: {}]   ;;  %s2086_s3 = inlined_call_operand.vmem [shape: f32[64,128], index: 3, kind: input, shape index: {}]   ;;  %s2087_s4 = inlined_call_operand.vmem [shape: f32[8,128], index: 4, kind: output, shape index: {}]  }
   0x1   :  { %s18_s17 = sshll.u32 %s2085_s2, 4  ;;  %s20_s19 = sshll.u32 %s1248_s18, 4  ;;  %s19_s17 = int_to_ptr.hbm [resolvable:$true] %s18_s17  ;;  %s21_s19 = int_to_ptr.vmem [resolvable:$true] %s20_s19 }
   0x2   :  { %s1250_s21 = smov 48  }
   0x3   :  { %26 = dma.hbm_to_vmem [thread:$0]  %s19_s17, 12288, %s21_s19, [#allocation3], %s1249_s20, %s1249_s20, %s1250_s21  }
   0x4   :  { %1246 = dma.done.wait [#allocation3], 12288  }
   0x5   :  { %1247 = vsyncadd [#allocation3], 4294955008  ;;  %v1251_v0 = vmov 0.0   ;;  %s1252_s22 = smov 32   ;;  %v40_v1 = vld [vmem:[%s2086_s3 + $0x8] sm:$0xff]  ;;  %v1287_v2 = vld [vmem:[#allocation2 + $0x2d0] sm:$0xff]  ;;  %v177_v37 = vlaneseq }
   0x6   :  { %183 = vrot.lane.b32.xlu0 %v1251_v0, %s1252_s22  ;;  %v1289_v3 = vld [vmem:[#allocation2 + $0x2d8] sm:$0xff]  ;;  %60 = vmatpush.msra.mxu0 %v40_v1  ;;  %v1292_v4 = vld [vmem:[#allocation2 + $0x2a0] sm:$0xff]  ;;  %v1294_v5 = vld [vmem:[#allocation2 + $0x2a8] sm:$0xff]  ;;  %vm41_vm0 = vcmask 64512   ;;  %s1253_s7 = smov 64   ;;  %s1254_s8 = smov 96  }
   0x7   :  { %218 = vmatpush.msra.mxu3 %v1287_v2  ;;  %v1297_v6 = vld [vmem:[#allocation2 + $0x270] sm:$0xff]  ;;  %v1300_v7 = vld [vmem:[#allocation2 + $0x278] sm:$0xff]  ;;  %v1303_v8 = vld [vmem:[#allocation2 + $0x240] sm:$0xff]  ;;  %v1416_v38 = vand.u32 127, %v177_v37 }
   0x8   :  { %238 = vmatpush.msrb.mxu0 %v1289_v3  ;;  %v1306_v9 = vld [vmem:[#allocation2 + $0x248] sm:$0xff]  ;;  %v1309_v10 = vld [vmem:[#allocation2 + $0x210] sm:$0xff]  ;;  %v1312_v11 = vld [vmem:[#allocation2 + $0x218] sm:$0xff] }
   0x9   :  { %219 = vmatpush.msra.mxu3 %v1292_v4  ;;  %v1315_v12 = vld [vmem:[#allocation2 + $0x1e0] sm:$0xff]  ;;  %v1321_v14 = vld [vmem:[#allocation2 + $0x1e8] sm:$0xff]  ;;  %v1325_v15 = vld [vmem:[#allocation2 + $0x1b0] sm:$0xff]  ;;  %vm182_vm1 = vcmp.lt.s32.totalorder %v1416_v38, 32  ;;  %vm179_vm3 = vcmp.ge.s32.totalorder %v1416_v38, 64  ;;  %vm180_vm4 = vcmp.lt.s32.totalorder %v1416_v38, 96 }
   0xa   :  { %239 = vmatpush.msrb.mxu0 %v1294_v5  ;;  %v39_v13 = vld [vmem:[%s2084_s1] sm:$0xff]  ;;  %v1331_v17 = vld [vmem:[#allocation2 + $0x1b8] sm:$0xff]  ;;  %v1341_v20 = vld [vmem:[#allocation2 + $0x188] sm:$0xff] }
   0xb   :  { %220 = vmatpush.msra.mxu3 %v1297_v6  ;;  %1090 = vmatmul.msk.f32.vlgmr.msra.gmra.mxu0 %vm41_vm0, %v39_v13  ;;  %v111_v16 = vld [vmem:[%s2086_s3] sm:$0xff]  ;;  %v1344_v21 = vld [vmem:[#allocation2 + $0x150] sm:$0xff]  ;;  %v1347_v22 = vld [vmem:[#allocation2 + $0x158] sm:$0xff] }
   0xc   :  { %240 = vmatpush.msrb.mxu0 %v1300_v7  ;;  %151 = vmatpush.msra.mxu2 %v111_v16  ;;  %v103_v18 = vld [vmem:[%s2083_s0] sm:$0xff]  ;;  %v1353_v24 = vld [vmem:[#allocation2 + $0x128] sm:$0xff]  ;;  %v1356_v25 = vld [vmem:[#allocation2 + $0xf0] sm:$0xff] }
   0xd   :  { %221 = vmatpush.msra.mxu3 %v1303_v8  ;;  %v1337_v19 = vld [vmem:[#allocation2 + $0x180] sm:$0xff]  ;;  %1091 = vmatmul.msk.f32.vlgmr.msra.gmra.mxu2 %vm41_vm0, %v103_v18  ;;  %v1359_v26 = vld [vmem:[#allocation2 + $0xf8] sm:$0xff]  ;;  %v1365_v28 = vld [vmem:[#allocation2 + $0xc8] sm:$0xff] }
   0xe   :  { %241 = vmatpush.msrb.mxu0 %v1306_v9  ;;  %v1350_v23 = vld [vmem:[#allocation2 + $0x120] sm:$0xff]  ;;  %v1368_v29 = vld [vmem:[#allocation2 + $0x90] sm:$0xff]  ;;  %v1371_v30 = vld [vmem:[#allocation2 + $0x98] sm:$0xff] }
   0xf   :  { %222 = vmatpush.msra.mxu3 %v1309_v10  ;;  %v1362_v27 = vld [vmem:[#allocation2 + $0xc0] sm:$0xff]  ;;  %2095 = vst [vmem:[#allocation5_spill] sm:$0xff] %v1371_v30  ;;  %v1377_v32 = vld [vmem:[#allocation2 + $0x68] sm:$0xff]  ;;  %v1380_v33 = vld [vmem:[#allocation2 + $0x30] sm:$0xff] }
  0x10   :  { %242 = vmatpush.msrb.mxu0 %v1312_v11  ;;  %v1374_v31 = vld [vmem:[#allocation2 + $0x60] sm:$0xff]  ;;  %2096 = vst [vmem:[#allocation6_spill] sm:$0xff] %v1377_v32  ;;  %v1383_v34 = vld [vmem:[#allocation2 + $0x38] sm:$0xff]  ;;  %v1390_v36 = vld [vmem:[#allocation2 + $0x8] sm:$0xff] }
  0x11   :  { %223 = vmatpush.msra.mxu3 %v1315_v12  ;;  %2097 = vst [vmem:[#allocation7_spill] sm:$0xff] %v1383_v34  ;;  %v1388_v35 = vld [vmem:[#allocation2] sm:$0xff]  ;;  %vm1099_vm2 = vmneg %vm182_vm1  ;;  %v81_v40 = vld [vmem:[#allocation2 + $0x2e8] sm:$0xff] }
  0x12   :  { %243 = vmatpush.msrb.mxu0 %v1321_v14  ;;  %2098 = vst [vmem:[#allocation8_spill] sm:$0xff] %v1390_v36  ;;  %v80_v41 = vld [vmem:[#allocation2 + $0x2b8] sm:$0xff]  ;;  %82 = vmatpush.msra.mxu1 %v81_v40  ;;  %v79_v42 = vld [vmem:[#allocation2 + $0x288] sm:$0xff]  ;;  %v1450_v43 = vld [vmem:[%s2086_s3 + $0x10] sm:$0xff] }
  0x13   :  { %224 = vmatpush.msra.mxu3 %v1325_v15  ;;  %v78_v45 = vld [vmem:[#allocation2 + $0x258] sm:$0xff]  ;;  %v1452_v46 = vld [vmem:[#allocation2 + $0x2e0] sm:$0xff]  ;;  %v77_v48 = vld [vmem:[#allocation2 + $0x228] sm:$0xff] }
  0x14   :  { %244 = vmatpush.msrb.mxu0 %v1331_v17  ;;  %83 = vmatpush.msra.mxu1 %v80_v41  ;;  %v1457_v49 = vld [vmem:[#allocation2 + $0x2b0] sm:$0xff]  ;;  %v76_v50 = vld [vmem:[#allocation2 + $0x1f8] sm:$0xff]  ;;  %v1461_v52 = vld [vmem:[#allocation2 + $0x280] sm:$0xff] }
  0x15   :  { %225 = vmatpush.msra.mxu3 %v1337_v19  ;;  %388 = vmatpush.msrb.mxu2 %v1452_v46  ;;  %v75_v54 = vld [vmem:[#allocation2 + $0x1c8] sm:$0xff]  ;;  %v1465_v55 = vld [vmem:[#allocation2 + $0x250] sm:$0xff]  ;;  %v74_v56 = vld [vmem:[#allocation2 + $0x198] sm:$0xff] }
  0x16   :  { %245 = vmatpush.msrb.mxu0 %v1341_v20  ;;  %84 = vmatpush.msra.mxu1 %v79_v42  ;;  %v1469_v57 = vld [vmem:[#allocation2 + $0x220] sm:$0xff]  ;;  %v73_v58 = vld [vmem:[#allocation2 + $0x168] sm:$0xff]  ;;  %v1473_v59 = vld [vmem:[#allocation2 + $0x1f0] sm:$0xff] }
  0x17   :  { %226 = vmatpush.msra.mxu3 %v1344_v21  ;;  %389 = vmatpush.msrb.mxu2 %v1457_v49  ;;  %v72_v60 = vld [vmem:[#allocation2 + $0x138] sm:$0xff]  ;;  %v1479_v61 = vld [vmem:[#allocation2 + $0x1c0] sm:$0xff]  ;;  %v71_v63 = vld [vmem:[#allocation2 + $0x108] sm:$0xff] }
  0x18   :  { %246 = vmatpush.msrb.mxu0 %v1347_v22  ;;  %85 = vmatpush.msra.mxu1 %v78_v45  ;;  %v1483_v1 = vld [vmem:[#allocation2 + $0x190] sm:$0xff]  ;;  %vm1485_vm5 = vmand %vm179_vm3, %vm180_vm4  ;;  %v70_v16 = vld [vmem:[#allocation2 + $0xd8] sm:$0xff] }
  0x19   :  { %227 = vmatpush.msra.mxu3 %v1350_v23  ;;  %390 = vmatpush.msrb.mxu2 %v1461_v52  ;;  %v1491_v37 = vld [vmem:[#allocation2 + $0x160] sm:$0xff]  ;;  %v69_v40 = vld [vmem:[#allocation2 + $0xa8] sm:$0xff]  ;;  %v1024_v13 = vld [vmem:[#allocation2 + $0x290] sm:$0xff] }
  0x1a   :  { %247 = vmatpush.msrb.mxu0 %v1353_v24  ;;  %86 = vmatpush.msra.mxu1 %v77_v48  ;;  %v66_v48 = vld [vmem:[#allocation2 + $0x18] sm:$0xff] }
  0x1b   :  { %228 = vmatpush.msra.mxu3 %v1356_v25  ;;  %391 = vmatpush.msrb.mxu2 %v1465_v55  ;;  %v38_v38 = vld [vmem:[%s2086_s3 + $0x38] sm:$0xff] }
  0x1c   :  { %248 = vmatpush.msrb.mxu0 %v1359_v26  ;;  %87 = vmatpush.msra.mxu1 %v76_v50 }
  0x1d   :  { %229 = vmatpush.msra.mxu3 %v1362_v27  ;;  %392 = vmatpush.msrb.mxu2 %v1469_v57 }
  0x1e   :  { %249 = vmatpush.msrb.mxu0 %v1365_v28  ;;  %88 = vmatpush.msra.mxu1 %v75_v54  ;;  %v1526_v54 = vld [vmem:[#allocation2 + $0xd0] sm:$0xff] }
  0x1f   :  { %230 = vmatpush.msra.mxu3 %v1368_v29  ;;  %393 = vmatpush.msrb.mxu2 %v1473_v59 }
  0x20   :  { %250 = vmatpush.msrb.mxu0 %v1371_v30  ;;  %89 = vmatpush.msra.mxu1 %v74_v56  ;;  %v1530_v56 = vld [vmem:[#allocation2 + $0xa0] sm:$0xff] }
  0x21   :  { %231 = vmatpush.msra.mxu3 %v1374_v31  ;;  %394 = vmatpush.msrb.mxu2 %v1479_v61 }
  0x22   :  { %251 = vmatpush.msrb.mxu0 %v1377_v32  ;;  %90 = vmatpush.msra.mxu1 %v73_v58  ;;  %v1536_v58 = vld [vmem:[#allocation2 + $0x70] sm:$0xff] }
  0x23   :  { %232 = vmatpush.msra.mxu3 %v1380_v33  ;;  %395 = vmatpush.msrb.mxu2 %v1483_v1 }
  0x24   :  { %252 = vmatpush.msrb.mxu0 %v1383_v34  ;;  %91 = vmatpush.msra.mxu1 %v72_v60  ;;  %v1541_v60 = vld [vmem:[#allocation2 + $0x40] sm:$0xff] }
  0x25   :  { %233 = vmatpush.msra.mxu3 %v1388_v35  ;;  %396 = vmatpush.msrb.mxu2 %v1491_v37 }
  0x26   :  { %253 = vmatpush.msrb.mxu0 %v1390_v36  ;;  %92 = vmatpush.msra.mxu1 %v71_v63 }
  0x27   :  { %331 = vmatpush.msrb.mxu3 %v1287_v2 }
  0x28   :  { %351 = vmatpush.msra.mxu0 %v1289_v3  ;;  %93 = vmatpush.msra.mxu1 %v70_v16 }
  0x29   :  { %332 = vmatpush.msrb.mxu3 %v1292_v4 }
  0x2a   :  { %352 = vmatpush.msra.mxu0 %v1294_v5  ;;  %94 = vmatpush.msra.mxu1 %v69_v40 }
  0x2b   :  { %333 = vmatpush.msrb.mxu3 %v1297_v6 }
  0x2c   :  { %353 = vmatpush.msra.mxu0 %v1300_v7 }
  0x2d   :  { %334 = vmatpush.msrb.mxu3 %v1303_v8 }
  0x2e   :  { %354 = vmatpush.msra.mxu0 %v1306_v9 }
  0x2f   :  { %335 = vmatpush.msrb.mxu3 %v1309_v10 }
  0x30   :  { %355 = vmatpush.msra.mxu0 %v1312_v11 }
  0x31   :  { %336 = vmatpush.msrb.mxu3 %v1315_v12 }
  0x32   :  { %356 = vmatpush.msra.mxu0 %v1321_v14 }
  0x33   :  { %337 = vmatpush.msrb.mxu3 %v1325_v15 }
  0x34   :  { %357 = vmatpush.msra.mxu0 %v1331_v17 }
  0x35   :  { %338 = vmatpush.msrb.mxu3 %v1337_v19 }
  0x36   :  { %358 = vmatpush.msra.mxu0 %v1341_v20 }
  0x37   :  { %339 = vmatpush.msrb.mxu3 %v1344_v21 }
  0x38   :  { %359 = vmatpush.msra.mxu0 %v1347_v22 }
  0x39   :  { %340 = vmatpush.msrb.mxu3 %v1350_v23 }
  0x3a   :  { %360 = vmatpush.msra.mxu0 %v1353_v24 }
  0x3b   :  { %341 = vmatpush.msrb.mxu3 %v1356_v25 }
  0x3c   :  { %361 = vmatpush.msra.mxu0 %v1359_v26 }
  0x3d   :  { %342 = vmatpush.msrb.mxu3 %v1362_v27 }
  0x3e   :  { %362 = vmatpush.msra.mxu0 %v1365_v28 }
  0x3f   :  { %343 = vmatpush.msrb.mxu3 %v1368_v29 }
  0x40   :  { %363 = vmatpush.msra.mxu0 %v1371_v30 }
  0x41   :  { %344 = vmatpush.msrb.mxu3 %v1374_v31 }
  0x42   :  { %364 = vmatpush.msra.mxu0 %v1377_v32 }
  0x43   :  { %345 = vmatpush.msrb.mxu3 %v1380_v33 }
  0x44   :  { %365 = vmatpush.msra.mxu0 %v1383_v34 }
  0x45   :  { %346 = vmatpush.msrb.mxu3 %v1388_v35 }
  0x46   :  { %366 = vmatpush.msra.mxu0 %v1390_v36 }
  0x78   :  { %v184_v39 = vpop.permute.xlu0 %183 }
  0x79   :  { %1100 = vmatmul.msk.f32.vlgmr.msra.gmra.mxu3 %vm1099_vm2, %v184_v39  ;;  %1102 = vmatmul.msk.f32.vlgmr.msrb.gmra.mxu0 %vm1099_vm2, %v184_v39  ;;  %v35_v39 = vld [vmem:[%s2086_s3 + $0x20] sm:$0xff] }
  0x7a   :  { %448 = vmatpush.msra.mxu3 %v1289_v3  ;;  %485 = vmatpush.msrb.mxu0 %v1452_v46 }
  0x7c   :  { %449 = vmatpush.msra.mxu3 %v1294_v5  ;;  %486 = vmatpush.msrb.mxu0 %v1457_v49 }
  0x7e   :  { %450 = vmatpush.msra.mxu3 %v1300_v7  ;;  %487 = vmatpush.msrb.mxu0 %v1461_v52 }
  0x80   :  { %451 = vmatpush.msra.mxu3 %v1306_v9  ;;  %488 = vmatpush.msrb.mxu0 %v1465_v55 }
  0x82   :  { %452 = vmatpush.msra.mxu3 %v1312_v11  ;;  %489 = vmatpush.msrb.mxu0 %v1469_v57 }
  0x84   :  { %453 = vmatpush.msra.mxu3 %v1321_v14  ;;  %490 = vmatpush.msrb.mxu0 %v1473_v59 }
  0x86   :  { %454 = vmatpush.msra.mxu3 %v1331_v17  ;;  %491 = vmatpush.msrb.mxu0 %v1479_v61 }
  0x88   :  { %455 = vmatpush.msra.mxu3 %v1341_v20  ;;  %492 = vmatpush.msrb.mxu0 %v1483_v1  ;;  %v62_v42 = vpop.f32.mrf.mxu0 }
  0x89   :  { %v63_v45 = vadd.f32 %v62_v42, %v35_v39 }
  0x8a   :  { %456 = vmatpush.msra.mxu3 %v1347_v22  ;;  %493 = vmatpush.msrb.mxu0 %v1491_v37 }
  0x8b   :  { %v65_v50 = vmax.f32 %v63_v45, 0.0 }
  0x8c   :  { %457 = vmatpush.msra.mxu3 %v1353_v24 }
  0x8e   :  { %458 = vmatpush.msra.mxu3 %v1359_v26 }
  0x90   :  { %459 = vmatpush.msra.mxu3 %v1365_v28  ;;  %v153_v44 = vpop.f32.mrf.mxu2 }
  0x91   :  { %v258_v47 = vadd.f32 %v153_v44, %v1450_v43  ;;  %v68_v44 = vld [vmem:[#allocation2 + $0x78] sm:$0xff] }
  0x92   :  { %460 = vmatpush.msra.mxu3 %v1371_v30  ;;  %95 = vmatpush.msra.mxu1 %v68_v44 }
  0x94   :  { %461 = vmatpush.msra.mxu3 %v1377_v32 }
  0x96   :  { %462 = vmatpush.msra.mxu3 %v1383_v34 }
  0x98   :  { %463 = vmatpush.msra.mxu3 %v1390_v36 }
  0xf6   :  { %v255_v45 = vpop.f32.mrf.mxu0 }
  0xfc   :  { %v235_v51 = vpop.f32.mrf.mxu3 }
  0xfd   :  { %v259_v53 = vadd.f32 %v258_v47, %v235_v51  ;;  %v67_v47 = vld [vmem:[#allocation2 + $0x48] sm:$0xff]  ;;  %v1517_v51 = vld [vmem:[#allocation2 + $0x130] sm:$0xff] }
  0xfe   :  { %96 = vmatpush.msra.mxu1 %v67_v47  ;;  %397 = vmatpush.msrb.mxu2 %v1517_v51  ;;  %v1609_v47 = vld [vmem:[%s2086_s3 + $0x18] sm:$0xff] }
  0xff   :  { %1110 = vtanh.f32 %v259_v53  ;;  %v1521_v53 = vld [vmem:[#allocation2 + $0x100] sm:$0xff]  ;;  %494 = vmatpush.msrb.mxu0 %v1517_v51  ;;  %2102 = vst [vmem:[#allocation10_spill] sm:$0xff] %v1609_v47 }
 0x100   :  { %97 = vmatpush.msra.mxu1 %v66_v48  ;;  %398 = vmatpush.msrb.mxu2 %v1521_v53 }
 0x101   :  { %98 = vmatmul.f32.vlgmr.msra.gmra.mxu1 %v65_v50  ;;  %495 = vmatpush.msrb.mxu0 %v1521_v53 }
 0x102   :  { %291 = vmatpush.msrb.mxu1 %v1452_v46  ;;  %399 = vmatpush.msrb.mxu2 %v1526_v54 }
 0x103   :  { %496 = vmatpush.msrb.mxu0 %v1526_v54 }
 0x104   :  { %292 = vmatpush.msrb.mxu1 %v1457_v49  ;;  %400 = vmatpush.msrb.mxu2 %v1530_v56 }
 0x105   :  { %v1111_v62 = vpop.eup %1110  ;;  %497 = vmatpush.msrb.mxu0 %v1530_v56 }
 0x106   :  { %v261_v0 = vmul.f32 0.5, %v1111_v62  ;;  %293 = vmatpush.msrb.mxu1 %v1461_v52  ;;  %401 = vmatpush.msrb.mxu2 %v1536_v58 }
 0x107   :  { %498 = vmatpush.msrb.mxu0 %v1536_v58 }
 0x108   :  { %v262_v18 = vadd.f32 0.5, %v261_v0  ;;  %294 = vmatpush.msrb.mxu1 %v1465_v55  ;;  %402 = vmatpush.msrb.mxu2 %v1541_v60 }
 0x109   :  { %499 = vmatpush.msrb.mxu0 %v1541_v60 }
 0x10a   :  { %v1500_v41 = vsel %vm1485_vm5, %v1111_v62, %v262_v18  ;;  %295 = vmatpush.msrb.mxu1 %v1469_v57  ;;  %v1546_v62 = vld [vmem:[#allocation2 + $0x10] sm:$0xff] }
 0x10b   :  { %266 = vrot.lane.b32.xlu1 %v1500_v41, %s1253_s7  ;;  %264 = vrot.lane.b32.xlu0 %v1500_v41, %s1254_s8 }
 0x10c   :  { %296 = vmatpush.msrb.mxu1 %v1473_v59  ;;  %403 = vmatpush.msrb.mxu2 %v1546_v62 }
 0x10d   :  { %500 = vmatpush.msrb.mxu0 %v1546_v62 }
 0x10e   :  { %297 = vmatpush.msrb.mxu1 %v1479_v61  ;;  %525 = vmatpush.msra.mxu2 %v1287_v2 }
 0x110   :  { %298 = vmatpush.msrb.mxu1 %v1483_v1  ;;  %526 = vmatpush.msra.mxu2 %v1292_v4 }
 0x112   :  { %299 = vmatpush.msrb.mxu1 %v1491_v37  ;;  %527 = vmatpush.msra.mxu2 %v1297_v6 }
 0x113   :  { %268 = vrot.lane.b32.xlu1 %v1500_v41, %s1252_s22 }
 0x114   :  { %300 = vmatpush.msrb.mxu1 %v1517_v51  ;;  %528 = vmatpush.msra.mxu2 %v1303_v8 }
 0x116   :  { %301 = vmatpush.msrb.mxu1 %v1521_v53  ;;  %529 = vmatpush.msra.mxu2 %v1309_v10 }
 0x118   :  { %302 = vmatpush.msrb.mxu1 %v1526_v54  ;;  %530 = vmatpush.msra.mxu2 %v1315_v12 }
 0x11a   :  { %303 = vmatpush.msrb.mxu1 %v1530_v56  ;;  %531 = vmatpush.msra.mxu2 %v1325_v15 }
 0x11c   :  { %304 = vmatpush.msrb.mxu1 %v1536_v58  ;;  %532 = vmatpush.msra.mxu2 %v1337_v19 }
 0x11e   :  { %305 = vmatpush.msrb.mxu1 %v1541_v60  ;;  %533 = vmatpush.msra.mxu2 %v1344_v21 }
 0x120   :  { %306 = vmatpush.msrb.mxu1 %v1546_v62  ;;  %534 = vmatpush.msra.mxu2 %v1350_v23 }
 0x122   :  { %428 = vmatpush.msra.mxu1 %v1287_v2  ;;  %535 = vmatpush.msra.mxu2 %v1356_v25 }
 0x124   :  { %429 = vmatpush.msra.mxu1 %v1292_v4  ;;  %536 = vmatpush.msra.mxu2 %v1362_v27 }
 0x126   :  { %430 = vmatpush.msra.mxu1 %v1297_v6  ;;  %537 = vmatpush.msra.mxu2 %v1368_v29 }
 0x128   :  { %431 = vmatpush.msra.mxu1 %v1303_v8  ;;  %538 = vmatpush.msra.mxu2 %v1374_v31 }
 0x12a   :  { %432 = vmatpush.msra.mxu1 %v1309_v10  ;;  %539 = vmatpush.msra.mxu2 %v1380_v33 }
 0x12c   :  { %433 = vmatpush.msra.mxu1 %v1315_v12  ;;  %540 = vmatpush.msra.mxu2 %v1388_v35 }
 0x12e   :  { %434 = vmatpush.msra.mxu1 %v1325_v15 }
 0x130   :  { %435 = vmatpush.msra.mxu1 %v1337_v19 }
 0x132   :  { %436 = vmatpush.msra.mxu1 %v1344_v21 }
 0x134   :  { %437 = vmatpush.msra.mxu1 %v1350_v23 }
 0x136   :  { %438 = vmatpush.msra.mxu1 %v1356_v25 }
 0x138   :  { %439 = vmatpush.msra.mxu1 %v1362_v27 }
 0x13a   :  { %440 = vmatpush.msra.mxu1 %v1368_v29 }
 0x13c   :  { %441 = vmatpush.msra.mxu1 %v1374_v31 }
 0x13e   :  { %442 = vmatpush.msra.mxu1 %v1380_v33 }
 0x140   :  { %443 = vmatpush.msra.mxu1 %v1388_v35 }
 0x17d   :  { %v267_v63 = vpop.permute.xlu1 %266  ;;  %v265_v0 = vpop.permute.xlu0 %264 }
 0x17e   :  { %v271_v16 = vmul.f32 %v267_v63, %v1500_v41  ;;  %v270_v18 = vmul.f32 0.0, %v265_v0  ;;  %v1604_v44 = vpop.f32.mrf.mxu1 }
 0x17f   :  { %2101 = vst [vmem:[#allocation9_spill] sm:$0xff] %v1604_v44 }
 0x180   :  { %v1574_v39 = vadd.f32 %v271_v16, %v270_v18 }
 0x182   :  { %1112 = vtanh.f32 %v1574_v39 }
 0x185   :  { %v269_v41 = vpop.permute.xlu1 %268 }
 0x188   :  { %v1113_v40 = vpop.eup %1112 }
 0x189   :  { %v274_v42 = vmul.f32 %v1113_v40, %v269_v41  ;;  %v104_v41 = vld [vmem:[%s2083_s0 + $0x8] sm:$0xff] }
 0x18a   :  { %1092 = vmatmul.msk.f32.gmra.mxu2 %vm41_vm0, %v104_v41 }
 0x18b   :  { %307 = vmatmul.f32.vlgmr.msrb.gmra.mxu1 %v274_v42 }
 0x18c   :  { %545 = vmatpush.msrb.mxu1 %v1289_v3 }
 0x18e   :  { %546 = vmatpush.msrb.mxu1 %v1294_v5 }
 0x190   :  { %547 = vmatpush.msrb.mxu1 %v1300_v7 }
 0x192   :  { %548 = vmatpush.msrb.mxu1 %v1306_v9 }
 0x194   :  { %549 = vmatpush.msrb.mxu1 %v1312_v11 }
 0x196   :  { %550 = vmatpush.msrb.mxu1 %v1321_v14 }
 0x198   :  { %551 = vmatpush.msrb.mxu1 %v1331_v17 }
 0x19a   :  { %552 = vmatpush.msrb.mxu1 %v1341_v20 }
 0x19c   :  { %553 = vmatpush.msrb.mxu1 %v1347_v22 }
 0x19e   :  { %554 = vmatpush.msrb.mxu1 %v1353_v24 }
 0x1a0   :  { %555 = vmatpush.msrb.mxu1 %v1359_v26 }
 0x1a2   :  { %556 = vmatpush.msrb.mxu1 %v1365_v28 }
 0x1a4   :  { %557 = vmatpush.msrb.mxu1 %v1371_v30 }
 0x1a6   :  { %558 = vmatpush.msrb.mxu1 %v1377_v32 }
 0x1a8   :  { %559 = vmatpush.msrb.mxu1 %v1383_v34 }
 0x1aa   :  { %560 = vmatpush.msrb.mxu1 %v1390_v36 }
 0x208   :  { %v308_v48 = vpop.f32.mrf.mxu1 }
 0x209   :  { %v311_v50 = vadd.f32 %v308_v48, %v255_v45 }
 0x20b   :  { %v312_v63 = vadd.f32 %v311_v50, %v1609_v47 }
 0x20d   :  { %1114 = vtanh.f32 %v312_v63 }
 0x213   :  { %v1115_v0 = vpop.eup %1114 }
 0x214   :  { %v314_v16 = vmul.f32 0.5, %v1115_v0 }
 0x216   :  { %v315_v18 = vadd.f32 0.5, %v314_v16 }
 0x218   :  { %v316_v40 = vsel %vm1485_vm5, %v1115_v0, %v315_v18 }
 0x219   :  { %321 = vrot.lane.b32.xlu0 %v316_v40, %s1252_s22  ;;  %317 = vrot.lane.b32.xlu2 %v316_v40, %s1254_s8 }
 0x221   :  { %319 = vrot.lane.b32.xlu2 %v316_v40, %s1253_s7 }
 0x273   :  { %v318_v45 = vpop.permute.xlu2 %317 }
 0x274   :  { %v323_v63 = vmul.f32 0.0, %v318_v45 }
 0x27b   :  { %v320_v48 = vpop.permute.xlu2 %319 }
 0x27c   :  { %v324_v50 = vmul.f32 %v320_v48, %v316_v40 }
 0x27e   :  { %v1621_v16 = vadd.f32 %v324_v50, %v323_v63 }
 0x280   :  { %1116 = vtanh.f32 %v1621_v16 }
 0x286   :  { %v1117_v0 = vpop.eup %1116 }
 0x28b   :  { %v322_v18 = vpop.permute.xlu0 %321 }
 0x28c   :  { %v327_v44 = vmul.f32 %v1117_v0, %v322_v18  ;;  %v107_v0 = vld [vmem:[%s2083_s0 + $0x20] sm:$0xff]  ;;  %v108_v18 = vld [vmem:[%s2083_s0 + $0x28] sm:$0xff] }
 0x28e   :  { %328 = vrot.lane.b32.xlu1 %v327_v44, %s1252_s22  ;;  %v156_v44 = vpop.f32.mrf.mxu2 }
 0x300   :  { %v329_v47 = vpop.permute.xlu1 %328 }
 0x301   :  { %v330_v36 = vsel %vm182_vm1, %v274_v42, %v329_v47  ;;  %v106_v42 = vld [vmem:[%s2083_s0 + $0x18] sm:$0xff]  ;;  %v371_v47 = vadd.f32 %v156_v44, %v1450_v43 }
 0x302   :  { %347 = vmatmul.f32.vlgmr.msrb.gmra.mxu3 %v330_v36  ;;  %367 = vmatmul.f32.vlgmr.msra.gmra.mxu0 %v330_v36  ;;  %v105_v36 = vld [vmem:[%s2083_s0 + $0x10] sm:$0xff] }
 0x303   :  { %582 = vmatpush.msrb.mxu3 %v1452_v46  ;;  %622 = vmatpush.msra.mxu0 %v1287_v2 }
 0x304   :  { %1093 = vmatmul.msk.f32.gmra.mxu2 %vm41_vm0, %v105_v36  ;;  %v109_v36 = vld [vmem:[%s2083_s0 + $0x30] sm:$0xff] }
 0x305   :  { %583 = vmatpush.msrb.mxu3 %v1457_v49  ;;  %623 = vmatpush.msra.mxu0 %v1292_v4 }
 0x307   :  { %584 = vmatpush.msrb.mxu3 %v1461_v52  ;;  %624 = vmatpush.msra.mxu0 %v1297_v6 }
 0x309   :  { %585 = vmatpush.msrb.mxu3 %v1465_v55  ;;  %625 = vmatpush.msra.mxu0 %v1303_v8 }
 0x30b   :  { %586 = vmatpush.msrb.mxu3 %v1469_v57  ;;  %626 = vmatpush.msra.mxu0 %v1309_v10 }
 0x30c   :  { %1094 = vmatmul.msk.f32.gmra.mxu2 %vm41_vm0, %v106_v42  ;;  %v110_v42 = vld [vmem:[%s2083_s0 + $0x38] sm:$0xff] }
 0x30d   :  { %587 = vmatpush.msrb.mxu3 %v1473_v59  ;;  %627 = vmatpush.msra.mxu0 %v1315_v12 }
 0x30f   :  { %588 = vmatpush.msrb.mxu3 %v1479_v61  ;;  %628 = vmatpush.msra.mxu0 %v1325_v15 }
 0x311   :  { %589 = vmatpush.msrb.mxu3 %v1483_v1  ;;  %629 = vmatpush.msra.mxu0 %v1337_v19 }
 0x313   :  { %590 = vmatpush.msrb.mxu3 %v1491_v37  ;;  %630 = vmatpush.msra.mxu0 %v1344_v21 }
 0x314   :  { %1095 = vmatmul.msk.f32.gmra.mxu2 %vm41_vm0, %v107_v0 }
 0x315   :  { %591 = vmatpush.msrb.mxu3 %v1517_v51  ;;  %631 = vmatpush.msra.mxu0 %v1350_v23 }
 0x317   :  { %592 = vmatpush.msrb.mxu3 %v1521_v53  ;;  %632 = vmatpush.msra.mxu0 %v1356_v25 }
 0x319   :  { %593 = vmatpush.msrb.mxu3 %v1526_v54  ;;  %633 = vmatpush.msra.mxu0 %v1362_v27 }
 0x31b   :  { %594 = vmatpush.msrb.mxu3 %v1530_v56  ;;  %634 = vmatpush.msra.mxu0 %v1368_v29 }
 0x31c   :  { %1096 = vmatmul.msk.f32.gmra.mxu2 %vm41_vm0, %v108_v18 }
 0x31d   :  { %595 = vmatpush.msrb.mxu3 %v1536_v58  ;;  %635 = vmatpush.msra.mxu0 %v1374_v31 }
 0x31f   :  { %596 = vmatpush.msrb.mxu3 %v1541_v60  ;;  %636 = vmatpush.msra.mxu0 %v1380_v33 }
 0x321   :  { %597 = vmatpush.msrb.mxu3 %v1546_v62  ;;  %637 = vmatpush.msra.mxu0 %v1388_v35 }
 0x324   :  { %1097 = vmatmul.msk.f32.gmra.mxu2 %vm41_vm0, %v109_v36 }
 0x32c   :  { %1098 = vmatmul.msk.f32.gmra.mxu2 %vm41_vm0, %v110_v42 }
 0x385   :  { %v348_v40 = vpop.f32.mrf.mxu3 }
 0x386   :  { %v372_v41 = vadd.f32 %v371_v47, %v348_v40 }
 0x388   :  { %1118 = vtanh.f32 %v372_v41 }
 0x38e   :  { %v1119_v45 = vpop.eup %1118 }
 0x38f   :  { %v374_v48 = vmul.f32 0.5, %v1119_v45 }
 0x391   :  { %v375_v50 = vadd.f32 0.5, %v374_v48 }
 0x393   :  { %v376_v63 = vsel %vm1485_vm5, %v1119_v45, %v375_v50 }
 0x394   :  { %381 = vrot.lane.b32.xlu1 %v376_v63, %s1252_s22  ;;  %379 = vrot.lane.b32.xlu0 %v376_v63, %s1253_s7 }
 0x395   :  { %377 = vrot.lane.b32.xlu2 %v376_v63, %s1254_s8 }
 0x3ef   :  { %v378_v44 = vpop.permute.xlu2 %377 }
 0x3f0   :  { %v383_v40 = vmul.f32 %v378_v44, %v1574_v39  ;;  %v2103_v39 = vld [vmem:[#allocation8_spill] sm:$0xff] }
 0x406   :  { %v380_v47 = vpop.permute.xlu0 %379  ;;  %v382_v50 = vpop.permute.xlu1 %381 }
 0x407   :  { %v384_v41 = vmul.f32 %v380_v47, %v376_v63  ;;  %v1709_v63 = vpop.f32.mrf.mxu2 }
 0x409   :  { %v1690_v45 = vadd.f32 %v384_v41, %v383_v40  ;;  %v368_v40 = vpop.f32.mrf.mxu0 }
 0x40b   :  { %1120 = vtanh.f32 %v1690_v45 }
 0x40f   :  { %v1711_v18 = vpop.f32.mrf.mxu2 }
 0x410   :  { %2104 = vst [vmem:[#allocation11_spill] sm:$0xff] %v1711_v18 }
 0x411   :  { %v1121_v48 = vpop.eup %1120 }
 0x412   :  { %v387_v0 = vmul.f32 %v1121_v48, %v382_v50  ;;  %v2108_v50 = vld [vmem:[#allocation10_spill] sm:$0xff] }
 0x414   :  { %404 = vmatmul.f32.vlgmr.msrb.gmra.mxu2 %v387_v0 }
 0x415   :  { %642 = vmatpush.msrb.mxu2 %v1289_v3 }
 0x417   :  { %643 = vmatpush.msrb.mxu2 %v1294_v5  ;;  %v1713_v36 = vpop.f32.mrf.mxu2 }
 0x419   :  { %644 = vmatpush.msrb.mxu2 %v1300_v7 }
 0x41b   :  { %645 = vmatpush.msrb.mxu2 %v1306_v9 }
 0x41d   :  { %646 = vmatpush.msrb.mxu2 %v1312_v11 }
 0x41f   :  { %647 = vmatpush.msrb.mxu2 %v1321_v14  ;;  %v1715_v42 = vpop.f32.mrf.mxu2 }
 0x420   :  { %2105 = vst [vmem:[#allocation12_spill] sm:$0xff] %v1715_v42 }
 0x421   :  { %648 = vmatpush.msrb.mxu2 %v1331_v17 }
 0x423   :  { %649 = vmatpush.msrb.mxu2 %v1341_v20 }
 0x425   :  { %650 = vmatpush.msrb.mxu2 %v1347_v22 }
 0x427   :  { %651 = vmatpush.msrb.mxu2 %v1353_v24  ;;  %v1717_v44 = vpop.f32.mrf.mxu2 }
 0x428   :  { %2106 = vst [vmem:[#allocation13_spill] sm:$0xff] %v1717_v44 }
 0x429   :  { %652 = vmatpush.msrb.mxu2 %v1359_v26 }
 0x42b   :  { %653 = vmatpush.msrb.mxu2 %v1365_v28 }
 0x42d   :  { %654 = vmatpush.msrb.mxu2 %v1371_v30 }
 0x42f   :  { %655 = vmatpush.msrb.mxu2 %v1377_v32  ;;  %v1719_v47 = vpop.f32.mrf.mxu2 }
 0x430   :  { %2107 = vst [vmem:[#allocation14_spill] sm:$0xff] %v1719_v47 }
 0x431   :  { %656 = vmatpush.msrb.mxu2 %v1383_v34 }
 0x433   :  { %657 = vmatpush.msrb.mxu2 %v2103_v39 }
 0x497   :  { %v405_v41 = vpop.f32.mrf.mxu2 }
 0x498   :  { %v408_v48 = vadd.f32 %v405_v41, %v368_v40 }
 0x49a   :  { %v409_v32 = vadd.f32 %v408_v48, %v2108_v50 }
 0x49c   :  { %1122 = vtanh.f32 %v409_v32 }
 0x4a2   :  { %v1123_v34 = vpop.eup %1122 }
 0x4a3   :  { %v411_v39 = vmul.f32 0.5, %v1123_v34 }
 0x4a5   :  { %v412_v30 = vadd.f32 0.5, %v411_v39 }
 0x4a7   :  { %v413_v18 = vsel %vm1485_vm5, %v1123_v34, %v412_v30 }
 0x4a8   :  { %418 = vrot.lane.b32.xlu1 %v413_v18, %s1252_s22  ;;  %416 = vrot.lane.b32.xlu0 %v413_v18, %s1253_s7 }
 0x4a9   :  { %414 = vrot.lane.b32.xlu2 %v413_v18, %s1254_s8 }
 0x503   :  { %v415_v44 = vpop.permute.xlu2 %414 }
 0x504   :  { %v420_v42 = vmul.f32 %v415_v44, %v1621_v16 }
 0x51a   :  { %v417_v47 = vpop.permute.xlu0 %416  ;;  %v419_v39 = vpop.permute.xlu1 %418 }
 0x51b   :  { %v421_v40 = vmul.f32 %v417_v47, %v413_v18 }
 0x51d   :  { %v1728_v41 = vadd.f32 %v421_v40, %v420_v42 }
 0x51f   :  { %1124 = vtanh.f32 %v1728_v41 }
 0x525   :  { %v1125_v32 = vpop.eup %1124 }
 0x526   :  { %v424_v48 = vmul.f32 %v1125_v32, %v419_v39 }
 0x528   :  { %425 = vrot.lane.b32.xlu2 %v424_v48, %s1252_s22  ;;  %v1807_v48 = vld [vmem:[#allocation2 + $0x2d0] sm:$0xff] }
 0x582   :  { %v426_v30 = vpop.permute.xlu2 %425 }
 0x583   :  { %v427_v34 = vsel %vm182_vm1, %v387_v0, %v426_v30  ;;  %v1815_v30 = vld [vmem:[#allocation2 + $0x270] sm:$0xff] }
 0x584   :  { %444 = vmatmul.f32.vlgmr.msra.gmra.mxu1 %v427_v34  ;;  %464 = vmatmul.f32.vlgmr.msra.gmra.mxu3 %v427_v34  ;;  %v1819_v34 = vld [vmem:[#allocation2 + $0x240] sm:$0xff] }
 0x585   :  { %679 = vmatpush.msra.mxu1 %v1452_v46  ;;  %719 = vmatpush.msra.mxu3 %v1287_v2  ;;  %v468_v2 = vadd.f32 %v1709_v63, %v1450_v43 }
 0x587   :  { %680 = vmatpush.msra.mxu1 %v1457_v49  ;;  %720 = vmatpush.msra.mxu3 %v1292_v4 }
 0x589   :  { %681 = vmatpush.msra.mxu1 %v1461_v52  ;;  %721 = vmatpush.msra.mxu3 %v1297_v6 }
 0x58b   :  { %682 = vmatpush.msra.mxu1 %v1465_v55  ;;  %722 = vmatpush.msra.mxu3 %v1303_v8 }
 0x58d   :  { %683 = vmatpush.msra.mxu1 %v1469_v57  ;;  %723 = vmatpush.msra.mxu3 %v1309_v10 }
 0x58f   :  { %684 = vmatpush.msra.mxu1 %v1473_v59  ;;  %724 = vmatpush.msra.mxu3 %v1315_v12 }
 0x591   :  { %685 = vmatpush.msra.mxu1 %v1479_v61  ;;  %725 = vmatpush.msra.mxu3 %v1325_v15 }
 0x593   :  { %686 = vmatpush.msra.mxu1 %v1483_v1  ;;  %726 = vmatpush.msra.mxu3 %v1337_v19 }
 0x595   :  { %687 = vmatpush.msra.mxu1 %v1491_v37  ;;  %727 = vmatpush.msra.mxu3 %v1344_v21 }
 0x597   :  { %688 = vmatpush.msra.mxu1 %v1517_v51  ;;  %728 = vmatpush.msra.mxu3 %v1350_v23 }
 0x599   :  { %689 = vmatpush.msra.mxu1 %v1521_v53  ;;  %729 = vmatpush.msra.mxu3 %v1356_v25 }
 0x59b   :  { %690 = vmatpush.msra.mxu1 %v1526_v54  ;;  %730 = vmatpush.msra.mxu3 %v1362_v27 }
 0x59d   :  { %691 = vmatpush.msra.mxu1 %v1530_v56  ;;  %731 = vmatpush.msra.mxu3 %v1368_v29 }
 0x59f   :  { %692 = vmatpush.msra.mxu1 %v1536_v58  ;;  %732 = vmatpush.msra.mxu3 %v1374_v31 }
 0x5a1   :  { %693 = vmatpush.msra.mxu1 %v1541_v60  ;;  %733 = vmatpush.msra.mxu3 %v1380_v33 }
 0x5a3   :  { %694 = vmatpush.msra.mxu1 %v1546_v62  ;;  %734 = vmatpush.msra.mxu3 %v1388_v35 }
 0x601   :  { %v445_v4 = vpop.f32.mrf.mxu1 }
 0x602   :  { %v469_v6 = vadd.f32 %v468_v2, %v445_v4  ;;  %v1823_v2 = vld [vmem:[#allocation2 + $0x210] sm:$0xff]  ;;  %v1827_v4 = vld [vmem:[#allocation2 + $0x1e0] sm:$0xff] }
 0x604   :  { %1126 = vtanh.f32 %v469_v6  ;;  %v1831_v6 = vld [vmem:[#allocation2 + $0x1b0] sm:$0xff] }
 0x60a   :  { %v1127_v8 = vpop.eup %1126 }
 0x60b   :  { %v471_v10 = vmul.f32 0.5, %v1127_v8 }
 0x60d   :  { %v472_v12 = vadd.f32 0.5, %v471_v10  ;;  %v1839_v10 = vld [vmem:[#allocation2 + $0x150] sm:$0xff] }
 0x60f   :  { %v473_v15 = vsel %vm1485_vm5, %v1127_v8, %v472_v12  ;;  %v1835_v8 = vld [vmem:[#allocation2 + $0x180] sm:$0xff] }
 0x610   :  { %478 = vrot.lane.b32.xlu2 %v473_v15, %s1252_s22  ;;  %476 = vrot.lane.b32.xlu1 %v473_v15, %s1253_s7  ;;  %v1843_v12 = vld [vmem:[#allocation2 + $0x120] sm:$0xff] }
 0x611   :  { %474 = vrot.lane.b32.xlu0 %v473_v15, %s1254_s8 }
 0x66a   :  { %v479_v31 = vpop.permute.xlu2 %478 }
 0x682   :  { %v477_v19 = vpop.permute.xlu1 %476 }
 0x683   :  { %v481_v21 = vmul.f32 %v477_v19, %v473_v15  ;;  %v475_v23 = vpop.permute.xlu0 %474  ;;  %v1847_v15 = vld [vmem:[#allocation2 + $0xf0] sm:$0xff]  ;;  %v1851_v19 = vld [vmem:[#allocation2 + $0xc0] sm:$0xff] }
 0x684   :  { %v480_v25 = vmul.f32 %v475_v23, %v1690_v45  ;;  %v1859_v23 = vld [vmem:[#allocation2 + $0x60] sm:$0xff] }
 0x686   :  { %v1774_v27 = vadd.f32 %v481_v21, %v480_v25  ;;  %v1855_v21 = vld [vmem:[#allocation2 + $0x90] sm:$0xff] }
 0x687   :  { %v2113_v25 = vld [vmem:[#allocation11_spill] sm:$0xff] }
 0x688   :  { %1128 = vtanh.f32 %v1774_v27 }
 0x68e   :  { %v1129_v29 = vpop.eup %1128 }
 0x68f   :  { %v484_v16 = vmul.f32 %v1129_v29, %v479_v31  ;;  %v565_v29 = vadd.f32 %v2113_v25, %v1450_v43  ;;  %v1916_v25 = vld [vmem:[#allocation2 + $0x68] sm:$0xff] }
 0x691   :  { %501 = vmatmul.f32.vlgmr.msrb.gmra.mxu0 %v484_v16 }
 0x692   :  { %739 = vmatpush.msrb.mxu0 %v1289_v3  ;;  %v2109_v3 = vld [vmem:[#allocation5_spill] sm:$0xff] }
 0x694   :  { %740 = vmatpush.msrb.mxu0 %v1294_v5  ;;  %v2110_v5 = vld [vmem:[#allocation6_spill] sm:$0xff] }
 0x696   :  { %741 = vmatpush.msrb.mxu0 %v1300_v7  ;;  %v2111_v7 = vld [vmem:[#allocation7_spill] sm:$0xff] }
 0x698   :  { %742 = vmatpush.msrb.mxu0 %v1306_v9  ;;  %v2112_v9 = vld [vmem:[#allocation8_spill] sm:$0xff] }
 0x69a   :  { %743 = vmatpush.msrb.mxu0 %v1312_v11  ;;  %v465_v11 = vpop.f32.mrf.mxu3 }
 0x69c   :  { %744 = vmatpush.msrb.mxu0 %v1321_v14 }
 0x69e   :  { %745 = vmatpush.msrb.mxu0 %v1331_v17 }
 0x6a0   :  { %746 = vmatpush.msrb.mxu0 %v1341_v20 }
 0x6a2   :  { %747 = vmatpush.msrb.mxu0 %v1347_v22 }
 0x6a4   :  { %748 = vmatpush.msrb.mxu0 %v1353_v24 }
 0x6a6   :  { %749 = vmatpush.msrb.mxu0 %v1359_v26 }
 0x6a8   :  { %750 = vmatpush.msrb.mxu0 %v1365_v28 }
 0x6aa   :  { %751 = vmatpush.msrb.mxu0 %v2109_v3 }
 0x6ac   :  { %752 = vmatpush.msrb.mxu0 %v2110_v5 }
 0x6ae   :  { %753 = vmatpush.msrb.mxu0 %v2111_v7 }
 0x6b0   :  { %754 = vmatpush.msrb.mxu0 %v2112_v9 }
 0x70e   :  { %v502_v14 = vpop.f32.mrf.mxu0 }
 0x70f   :  { %v505_v17 = vadd.f32 %v502_v14, %v465_v11 }
 0x711   :  { %v506_v20 = vadd.f32 %v505_v17, %v2108_v50 }
 0x713   :  { %1130 = vtanh.f32 %v506_v20 }
 0x719   :  { %v1131_v22 = vpop.eup %1130 }
 0x71a   :  { %v508_v24 = vmul.f32 0.5, %v1131_v22 }
 0x71c   :  { %v509_v45 = vadd.f32 0.5, %v508_v24  ;;  %v1877_v24 = vld [vmem:[#allocation2 + $0x2d8] sm:$0xff] }
 0x71e   :  { %v510_v26 = vsel %vm1485_vm5, %v1131_v22, %v509_v45  ;;  %v1880_v45 = vld [vmem:[#allocation2 + $0x2a8] sm:$0xff] }
 0x71f   :  { %515 = vrot.lane.b32.xlu2 %v510_v26, %s1252_s22  ;;  %513 = vrot.lane.b32.xlu1 %v510_v26, %s1253_s7 }
 0x720   :  { %511 = vrot.lane.b32.xlu0 %v510_v26, %s1254_s8 }
 0x779   :  { %v516_v47 = vpop.permute.xlu2 %515 }
 0x791   :  { %v514_v28 = vpop.permute.xlu1 %513 }
 0x792   :  { %v518_v0 = vmul.f32 %v514_v28, %v510_v26  ;;  %v512_v63 = vpop.permute.xlu0 %511  ;;  %v1883_v26 = vld [vmem:[#allocation2 + $0x278] sm:$0xff] }
 0x793   :  { %v517_v18 = vmul.f32 %v512_v63, %v1728_v41  ;;  %v1811_v41 = vld [vmem:[#allocation2 + $0x2a0] sm:$0xff]  ;;  %v1889_v28 = vld [vmem:[#allocation2 + $0x218] sm:$0xff] }
 0x794   :  { %v1895_v63 = vld [vmem:[#allocation2 + $0x1b8] sm:$0xff] }
 0x795   :  { %v1800_v42 = vadd.f32 %v518_v0, %v517_v18  ;;  %v1892_v0 = vld [vmem:[#allocation2 + $0x1e8] sm:$0xff] }
 0x796   :  { %v1898_v18 = vld [vmem:[#allocation2 + $0x188] sm:$0xff] }
 0x797   :  { %1132 = vtanh.f32 %v1800_v42 }
 0x79d   :  { %v1133_v44 = vpop.eup %1132 }
 0x79e   :  { %v521_v40 = vmul.f32 %v1133_v44, %v516_v47  ;;  %v1901_v44 = vld [vmem:[#allocation2 + $0x158] sm:$0xff]  ;;  %v1904_v47 = vld [vmem:[#allocation2 + $0x128] sm:$0xff] }
 0x7a0   :  { %522 = vrot.lane.b32.xlu0 %v521_v40, %s1252_s22  ;;  %v1907_v40 = vld [vmem:[#allocation2 + $0xf8] sm:$0xff] }
 0x812   :  { %v523_v32 = vpop.permute.xlu0 %522 }
 0x813   :  { %v524_v39 = vsel %vm182_vm1, %v484_v16, %v523_v32  ;;  %v1910_v32 = vld [vmem:[#allocation2 + $0xc8] sm:$0xff] }
 0x814   :  { %541 = vmatmul.f32.vlgmr.msra.gmra.mxu2 %v524_v39  ;;  %561 = vmatmul.f32.vlgmr.msrb.gmra.mxu1 %v524_v39  ;;  %v1913_v39 = vld [vmem:[#allocation2 + $0x98] sm:$0xff] }
 0x815   :  { %776 = vmatpush.msra.mxu2 %v1452_v46  ;;  %816 = vmatpush.msrb.mxu1 %v1807_v48 }
 0x817   :  { %777 = vmatpush.msra.mxu2 %v1457_v49  ;;  %817 = vmatpush.msrb.mxu1 %v1811_v41 }
 0x819   :  { %778 = vmatpush.msra.mxu2 %v1461_v52  ;;  %818 = vmatpush.msrb.mxu1 %v1815_v30 }
 0x81b   :  { %779 = vmatpush.msra.mxu2 %v1465_v55  ;;  %819 = vmatpush.msrb.mxu1 %v1819_v34 }
 0x81d   :  { %780 = vmatpush.msra.mxu2 %v1469_v57  ;;  %820 = vmatpush.msrb.mxu1 %v1823_v2 }
 0x81f   :  { %781 = vmatpush.msra.mxu2 %v1473_v59  ;;  %821 = vmatpush.msrb.mxu1 %v1827_v4 }
 0x821   :  { %782 = vmatpush.msra.mxu2 %v1479_v61  ;;  %822 = vmatpush.msrb.mxu1 %v1831_v6 }
 0x823   :  { %783 = vmatpush.msra.mxu2 %v1483_v1  ;;  %823 = vmatpush.msrb.mxu1 %v1835_v8 }
 0x825   :  { %784 = vmatpush.msra.mxu2 %v1491_v37  ;;  %824 = vmatpush.msrb.mxu1 %v1839_v10 }
 0x827   :  { %785 = vmatpush.msra.mxu2 %v1517_v51  ;;  %825 = vmatpush.msrb.mxu1 %v1843_v12 }
 0x829   :  { %786 = vmatpush.msra.mxu2 %v1521_v53  ;;  %826 = vmatpush.msrb.mxu1 %v1847_v15 }
 0x82b   :  { %787 = vmatpush.msra.mxu2 %v1526_v54  ;;  %827 = vmatpush.msrb.mxu1 %v1851_v19 }
 0x82d   :  { %788 = vmatpush.msra.mxu2 %v1530_v56  ;;  %828 = vmatpush.msrb.mxu1 %v1855_v21 }
 0x82f   :  { %789 = vmatpush.msra.mxu2 %v1536_v58  ;;  %829 = vmatpush.msrb.mxu1 %v1859_v23 }
 0x831   :  { %790 = vmatpush.msra.mxu2 %v1541_v60  ;;  %830 = vmatpush.msrb.mxu1 %v1380_v33 }
 0x833   :  { %791 = vmatpush.msra.mxu2 %v1546_v62  ;;  %831 = vmatpush.msrb.mxu1 %v1388_v35 }
 0x897   :  { %v542_v31 = vpop.f32.mrf.mxu2 }
 0x898   :  { %v566_v16 = vadd.f32 %v565_v29, %v542_v31  ;;  %v1919_v29 = vld [vmem:[#allocation2 + $0x38] sm:$0xff]  ;;  %v1922_v31 = vld [vmem:[#allocation2 + $0x8] sm:$0xff] }
 0x89a   :  { %1134 = vtanh.f32 %v566_v16  ;;  %v562_v16 = vpop.f32.mrf.mxu1 }
 0x8a0   :  { %v1135_v3 = vpop.eup %1134 }
 0x8a1   :  { %v568_v5 = vmul.f32 0.5, %v1135_v3 }
 0x8a3   :  { %v569_v7 = vadd.f32 0.5, %v568_v5 }
 0x8a5   :  { %v570_v9 = vsel %vm1485_vm5, %v1135_v3, %v569_v7 }
 0x8a6   :  { %575 = vrot.lane.b32.xlu0 %v570_v9, %s1252_s22  ;;  %573 = vrot.lane.b32.xlu2 %v570_v9, %s1253_s7 }
 0x8a7   :  { %571 = vrot.lane.b32.xlu1 %v570_v9, %s1254_s8 }
 0x900   :  { %v574_v33 = vpop.permute.xlu2 %573 }
 0x901   :  { %v578_v11 = vmul.f32 %v574_v33, %v570_v9 }
 0x918   :  { %v576_v20 = vpop.permute.xlu0 %575 }
 0x919   :  { %v572_v35 = vpop.permute.xlu1 %571 }
 0x91a   :  { %v577_v43 = vmul.f32 %v572_v35, %v1774_v27  ;;  %v1886_v27 = vld [vmem:[#allocation2 + $0x248] sm:$0xff] }
 0x91c   :  { %v1874_v14 = vadd.f32 %v578_v11, %v577_v43 }
 0x91e   :  { %1136 = vtanh.f32 %v1874_v14 }
 0x924   :  { %v1137_v17 = vpop.eup %1136 }
 0x925   :  { %v581_v22 = vmul.f32 %v1137_v17, %v576_v20 }
 0x927   :  { %598 = vmatmul.f32.vlgmr.msrb.gmra.mxu3 %v581_v22 }
 0x928   :  { %836 = vmatpush.msrb.mxu3 %v1877_v24 }
 0x92a   :  { %837 = vmatpush.msrb.mxu3 %v1880_v45 }
 0x92c   :  { %838 = vmatpush.msrb.mxu3 %v1883_v26 }
 0x92e   :  { %839 = vmatpush.msrb.mxu3 %v1886_v27 }
 0x930   :  { %840 = vmatpush.msrb.mxu3 %v1889_v28 }
 0x932   :  { %841 = vmatpush.msrb.mxu3 %v1892_v0 }
 0x934   :  { %842 = vmatpush.msrb.mxu3 %v1895_v63 }
 0x936   :  { %843 = vmatpush.msrb.mxu3 %v1898_v18 }
 0x938   :  { %844 = vmatpush.msrb.mxu3 %v1901_v44 }
 0x93a   :  { %845 = vmatpush.msrb.mxu3 %v1904_v47 }
 0x93c   :  { %846 = vmatpush.msrb.mxu3 %v1907_v40 }
 0x93e   :  { %847 = vmatpush.msrb.mxu3 %v1910_v32 }
 0x940   :  { %848 = vmatpush.msrb.mxu3 %v1913_v39 }
 0x942   :  { %849 = vmatpush.msrb.mxu3 %v1916_v25 }
 0x944   :  { %850 = vmatpush.msrb.mxu3 %v1919_v29 }
 0x946   :  { %851 = vmatpush.msrb.mxu3 %v1922_v31 }
 0x9aa   :  { %v599_v3 = vpop.f32.mrf.mxu3 }
 0x9ab   :  { %v602_v5 = vadd.f32 %v599_v3, %v562_v16 }
 0x9ad   :  { %v603_v7 = vadd.f32 %v602_v5, %v2108_v50 }
 0x9af   :  { %1138 = vtanh.f32 %v603_v7 }
 0x9b5   :  { %v1139_v9 = vpop.eup %1138 }
 0x9b6   :  { %v605_v33 = vmul.f32 0.5, %v1139_v9 }
 0x9b8   :  { %v606_v35 = vadd.f32 0.5, %v605_v33 }
 0x9ba   :  { %v607_v11 = vsel %vm1485_vm5, %v1139_v9, %v606_v35 }
 0x9bb   :  { %612 = vrot.lane.b32.xlu0 %v607_v11, %s1252_s22  ;;  %610 = vrot.lane.b32.xlu2 %v607_v11, %s1253_s7 }
 0x9bc   :  { %608 = vrot.lane.b32.xlu1 %v607_v11, %s1254_s8 }
 0xa15   :  { %v611_v43 = vpop.permute.xlu2 %610 }
 0xa16   :  { %v615_v20 = vmul.f32 %v611_v43, %v607_v11  ;;  %v1219_v11 = vld [vmem:[#allocation2 + $0xa0] sm:$0xff]  ;;  %v1220_v43 = vld [vmem:[#allocation2 + $0x70] sm:$0xff] }
 0xa2d   :  { %v613_v7 = vpop.permute.xlu0 %612 }
 0xa2e   :  { %v609_v17 = vpop.permute.xlu1 %608 }
 0xa2f   :  { %v614_v16 = vmul.f32 %v609_v17, %v1800_v42  ;;  %v2114_v17 = vld [vmem:[#allocation12_spill] sm:$0xff] }
 0xa31   :  { %v1932_v3 = vadd.f32 %v615_v20, %v614_v16 }
 0xa33   :  { %1140 = vtanh.f32 %v1932_v3 }
 0xa39   :  { %v1141_v5 = vpop.eup %1140 }
 0xa3a   :  { %v618_v33 = vmul.f32 %v1141_v5, %v613_v7 }
 0xa3c   :  { %619 = vrot.lane.b32.xlu1 %v618_v33, %s1252_s22 }
 0xaae   :  { %v620_v9 = vpop.permute.xlu1 %619 }
 0xaaf   :  { %v621_v35 = vsel %vm182_vm1, %v581_v22, %v620_v9 }
 0xab0   :  { %638 = vmatmul.f32.vlgmr.msra.gmra.mxu0 %v621_v35  ;;  %658 = vmatmul.f32.vlgmr.msrb.gmra.mxu2 %v621_v35 }
 0xab1   :  { %873 = vmatpush.msra.mxu0 %v1452_v46  ;;  %913 = vmatpush.msrb.mxu2 %v1807_v48  ;;  %v1204_v46 = vld [vmem:[#allocation2 + $0x30] sm:$0xff] }
 0xab3   :  { %874 = vmatpush.msra.mxu0 %v1457_v49  ;;  %914 = vmatpush.msrb.mxu2 %v1811_v41  ;;  %v1205_v49 = vld [vmem:[#allocation2] sm:$0xff] }
 0xab5   :  { %875 = vmatpush.msra.mxu0 %v1461_v52  ;;  %915 = vmatpush.msrb.mxu2 %v1815_v30  ;;  %v1971_v52 = vld [vmem:[%s2086_s3 + $0x10] sm:$0xff] }
 0xab6   :  { %v759_v20 = vadd.f32 %v1971_v52, %v2114_v17 }
 0xab7   :  { %876 = vmatpush.msra.mxu0 %v1465_v55  ;;  %916 = vmatpush.msrb.mxu2 %v1819_v34  ;;  %v662_v55 = vadd.f32 %v1971_v52, %v1713_v36 }
 0xab9   :  { %877 = vmatpush.msra.mxu0 %v1469_v57  ;;  %917 = vmatpush.msrb.mxu2 %v1823_v2 }
 0xabb   :  { %878 = vmatpush.msra.mxu0 %v1473_v59  ;;  %918 = vmatpush.msrb.mxu2 %v1827_v4 }
 0xabd   :  { %879 = vmatpush.msra.mxu0 %v1479_v61  ;;  %919 = vmatpush.msrb.mxu2 %v1831_v6 }
 0xabf   :  { %880 = vmatpush.msra.mxu0 %v1483_v1  ;;  %920 = vmatpush.msrb.mxu2 %v1835_v8 }
 0xac1   :  { %881 = vmatpush.msra.mxu0 %v1491_v37  ;;  %921 = vmatpush.msrb.mxu2 %v1839_v10 }
 0xac3   :  { %882 = vmatpush.msra.mxu0 %v1517_v51  ;;  %922 = vmatpush.msrb.mxu2 %v1843_v12 }
 0xac5   :  { %883 = vmatpush.msra.mxu0 %v1521_v53  ;;  %923 = vmatpush.msrb.mxu2 %v1847_v15 }
 0xac7   :  { %884 = vmatpush.msra.mxu0 %v1526_v54  ;;  %924 = vmatpush.msrb.mxu2 %v1851_v19 }
 0xac9   :  { %885 = vmatpush.msra.mxu0 %v1530_v56  ;;  %925 = vmatpush.msrb.mxu2 %v1855_v21 }
 0xacb   :  { %886 = vmatpush.msra.mxu0 %v1536_v58  ;;  %926 = vmatpush.msrb.mxu2 %v1859_v23 }
 0xacd   :  { %887 = vmatpush.msra.mxu0 %v1541_v60  ;;  %927 = vmatpush.msrb.mxu2 %v1204_v46 }
 0xacf   :  { %888 = vmatpush.msra.mxu0 %v1546_v62  ;;  %928 = vmatpush.msrb.mxu2 %v1205_v49 }
 0xb2d   :  { %v639_v57 = vpop.f32.mrf.mxu0 }
 0xb2e   :  { %v663_v59 = vadd.f32 %v662_v55, %v639_v57 }
 0xb30   :  { %1142 = vtanh.f32 %v663_v59 }
 0xb33   :  { %v659_v30 = vpop.f32.mrf.mxu2 }
 0xb36   :  { %v1143_v61 = vpop.eup %1142 }
 0xb37   :  { %v665_v1 = vmul.f32 0.5, %v1143_v61 }
 0xb39   :  { %v666_v37 = vadd.f32 0.5, %v665_v1 }
 0xb3b   :  { %v667_v51 = vsel %vm1485_vm5, %v1143_v61, %v666_v37 }
 0xb3c   :  { %672 = vrot.lane.b32.xlu1 %v667_v51, %s1252_s22  ;;  %670 = vrot.lane.b32.xlu0 %v667_v51, %s1253_s7 }
 0xb3d   :  { %668 = vrot.lane.b32.xlu2 %v667_v51, %s1254_s8 }
 0xb97   :  { %v669_v53 = vpop.permute.xlu2 %668 }
 0xb98   :  { %v674_v56 = vmul.f32 %v669_v53, %v1874_v14 }
 0xbae   :  { %v671_v54 = vpop.permute.xlu0 %670  ;;  %v673_v48 = vpop.permute.xlu1 %672 }
 0xbaf   :  { %v675_v58 = vmul.f32 %v671_v54, %v667_v51 }
 0xbb1   :  { %v1981_v36 = vadd.f32 %v675_v58, %v674_v56 }
 0xbb3   :  { %1144 = vtanh.f32 %v1981_v36 }
 0xbb9   :  { %v1145_v42 = vpop.eup %1144 }
 0xbba   :  { %v678_v41 = vmul.f32 %v1145_v42, %v673_v48 }
 0xbbc   :  { %695 = vmatmul.f32.vlgmr.msra.gmra.mxu1 %v678_v41 }
 0xbbd   :  { %933 = vmatpush.msra.mxu1 %v1877_v24 }
 0xbbf   :  { %934 = vmatpush.msra.mxu1 %v1880_v45 }
 0xbc1   :  { %935 = vmatpush.msra.mxu1 %v1883_v26 }
 0xbc3   :  { %936 = vmatpush.msra.mxu1 %v1886_v27 }
 0xbc5   :  { %937 = vmatpush.msra.mxu1 %v1889_v28  ;;  %v1207_v28 = vld [vmem:[#allocation2 + $0x2e0] sm:$0xff] }
 0xbc7   :  { %938 = vmatpush.msra.mxu1 %v1892_v0  ;;  %v1208_v0 = vld [vmem:[#allocation2 + $0x2b0] sm:$0xff] }
 0xbc9   :  { %939 = vmatpush.msra.mxu1 %v1895_v63  ;;  %v1209_v63 = vld [vmem:[#allocation2 + $0x280] sm:$0xff] }
 0xbcb   :  { %940 = vmatpush.msra.mxu1 %v1898_v18  ;;  %v1210_v18 = vld [vmem:[#allocation2 + $0x250] sm:$0xff] }
 0xbcd   :  { %941 = vmatpush.msra.mxu1 %v1901_v44  ;;  %v1211_v44 = vld [vmem:[#allocation2 + $0x220] sm:$0xff] }
 0xbcf   :  { %942 = vmatpush.msra.mxu1 %v1904_v47  ;;  %v1212_v47 = vld [vmem:[#allocation2 + $0x1f0] sm:$0xff] }
 0xbd1   :  { %943 = vmatpush.msra.mxu1 %v1907_v40  ;;  %v1213_v40 = vld [vmem:[#allocation2 + $0x1c0] sm:$0xff] }
 0xbd3   :  { %944 = vmatpush.msra.mxu1 %v1910_v32  ;;  %v1214_v32 = vld [vmem:[#allocation2 + $0x190] sm:$0xff] }
 0xbd5   :  { %945 = vmatpush.msra.mxu1 %v1913_v39  ;;  %v1215_v39 = vld [vmem:[#allocation2 + $0x160] sm:$0xff] }
 0xbd7   :  { %946 = vmatpush.msra.mxu1 %v1916_v25  ;;  %v1216_v25 = vld [vmem:[#allocation2 + $0x130] sm:$0xff] }
 0xbd9   :  { %947 = vmatpush.msra.mxu1 %v1919_v29  ;;  %v1217_v29 = vld [vmem:[#allocation2 + $0x100] sm:$0xff] }
 0xbdb   :  { %948 = vmatpush.msra.mxu1 %v1922_v31  ;;  %v1218_v31 = vld [vmem:[#allocation2 + $0xd0] sm:$0xff] }
 0xc39   :  { %v696_v34 = vpop.f32.mrf.mxu1 }
 0xc3a   :  { %v699_v2 = vadd.f32 %v696_v34, %v659_v30 }
 0xc3c   :  { %v700_v4 = vadd.f32 %v699_v2, %v2108_v50 }
 0xc3e   :  { %1146 = vtanh.f32 %v700_v4 }
 0xc44   :  { %v1147_v6 = vpop.eup %1146 }
 0xc45   :  { %v702_v8 = vmul.f32 0.5, %v1147_v6 }
 0xc47   :  { %v703_v10 = vadd.f32 0.5, %v702_v8  ;;  %v2115_v8 = vld [vmem:[#allocation13_spill] sm:$0xff] }
 0xc49   :  { %v704_v12 = vsel %vm1485_vm5, %v1147_v6, %v703_v10  ;;  %v856_v10 = vadd.f32 %v1971_v52, %v2115_v8 }
 0xc4a   :  { %709 = vrot.lane.b32.xlu1 %v704_v12, %s1252_s22  ;;  %707 = vrot.lane.b32.xlu0 %v704_v12, %s1253_s7 }
 0xc4b   :  { %705 = vrot.lane.b32.xlu2 %v704_v12, %s1254_s8 }
 0xca5   :  { %v706_v15 = vpop.permute.xlu2 %705 }
 0xca6   :  { %v711_v21 = vmul.f32 %v706_v15, %v1932_v3 }
 0xcbc   :  { %v708_v19 = vpop.permute.xlu0 %707  ;;  %v710_v24 = vpop.permute.xlu1 %709 }
 0xcbd   :  { %v712_v23 = vmul.f32 %v708_v19, %v704_v12 }
 0xcbf   :  { %v2007_v14 = vadd.f32 %v712_v23, %v711_v21 }
 0xcc1   :  { %1148 = vtanh.f32 %v2007_v14 }
 0xcc7   :  { %v1149_v22 = vpop.eup %1148 }
 0xcc8   :  { %v715_v45 = vmul.f32 %v1149_v22, %v710_v24 }
 0xcca   :  { %716 = vrot.lane.b32.xlu2 %v715_v45, %s1252_s22 }
 0xd24   :  { %v717_v26 = vpop.permute.xlu2 %716 }
 0xd25   :  { %v718_v27 = vsel %vm182_vm1, %v678_v41, %v717_v26 }
 0xd26   :  { %735 = vmatmul.f32.vlgmr.msra.gmra.mxu3 %v718_v27  ;;  %755 = vmatmul.f32.vlgmr.msrb.gmra.mxu0 %v718_v27 }
 0xd27   :  { %970 = vmatpush.msra.mxu3 %v1207_v28 }
 0xd29   :  { %971 = vmatpush.msra.mxu3 %v1208_v0 }
 0xd2b   :  { %972 = vmatpush.msra.mxu3 %v1209_v63 }
 0xd2d   :  { %973 = vmatpush.msra.mxu3 %v1210_v18 }
 0xd2f   :  { %974 = vmatpush.msra.mxu3 %v1211_v44 }
 0xd31   :  { %975 = vmatpush.msra.mxu3 %v1212_v47 }
 0xd33   :  { %976 = vmatpush.msra.mxu3 %v1213_v40  ;;  %v1221_v40 = vld [vmem:[%s2086_s3 + $0x18] sm:$0xff] }
 0xd35   :  { %977 = vmatpush.msra.mxu3 %v1214_v32 }
 0xd37   :  { %978 = vmatpush.msra.mxu3 %v1215_v39 }
 0xd39   :  { %979 = vmatpush.msra.mxu3 %v1216_v25 }
 0xd3b   :  { %980 = vmatpush.msra.mxu3 %v1217_v29 }
 0xd3d   :  { %981 = vmatpush.msra.mxu3 %v1218_v31 }
 0xd3f   :  { %982 = vmatpush.msra.mxu3 %v1219_v11 }
 0xd41   :  { %983 = vmatpush.msra.mxu3 %v1220_v43 }
 0xd43   :  { %984 = vmatpush.msra.mxu3 %v1541_v60 }
 0xd45   :  { %985 = vmatpush.msra.mxu3 %v1546_v62 }
 0xda3   :  { %v756_v61 = vpop.f32.mrf.mxu0 }
 0xda9   :  { %v736_v16 = vpop.f32.mrf.mxu3 }
 0xdaa   :  { %v760_v3 = vadd.f32 %v759_v20, %v736_v16 }
 0xdac   :  { %1150 = vtanh.f32 %v760_v3 }
 0xdb2   :  { %v1151_v5 = vpop.eup %1150 }
 0xdb3   :  { %v762_v7 = vmul.f32 0.5, %v1151_v5 }
 0xdb5   :  { %v763_v33 = vadd.f32 0.5, %v762_v7 }
 0xdb7   :  { %v764_v9 = vsel %vm1485_vm5, %v1151_v5, %v763_v33 }
 0xdb8   :  { %769 = vrot.lane.b32.xlu2 %v764_v9, %s1252_s22  ;;  %767 = vrot.lane.b32.xlu1 %v764_v9, %s1253_s7 }
 0xdb9   :  { %765 = vrot.lane.b32.xlu0 %v764_v9, %s1254_s8 }
 0xe12   :  { %v770_v57 = vpop.permute.xlu2 %769 }
 0xe2a   :  { %v768_v60 = vpop.permute.xlu1 %767 }
 0xe2b   :  { %v772_v62 = vmul.f32 %v768_v60, %v764_v9  ;;  %v766_v35 = vpop.permute.xlu0 %765  ;;  %v2116_v60 = vld [vmem:[#allocation14_spill] sm:$0xff] }
 0xe2c   :  { %v771_v46 = vmul.f32 %v766_v35, %v1981_v36 }
 0xe2e   :  { %v773_v49 = vadd.f32 %v772_v62, %v771_v46  ;;  %v953_v62 = vadd.f32 %v1971_v52, %v2116_v60 }
 0xe30   :  { %1152 = vtanh.f32 %v773_v49 }
 0xe36   :  { %v1153_v55 = vpop.eup %1152 }
 0xe37   :  { %v775_v59 = vmul.f32 %v1153_v55, %v770_v57 }
 0xe39   :  { %792 = vmatmul.f32.vlgmr.msra.gmra.mxu2 %v775_v59 }
 0xebc   :  { %v793_v1 = vpop.f32.mrf.mxu2 }
 0xebd   :  { %v796_v37 = vadd.f32 %v793_v1, %v756_v61 }
 0xebf   :  { %v797_v51 = vadd.f32 %v796_v37, %v2108_v50 }
 0xec1   :  { %1154 = vtanh.f32 %v797_v51 }
 0xec7   :  { %v1155_v53 = vpop.eup %1154 }
 0xec8   :  { %v799_v54 = vmul.f32 0.5, %v1155_v53 }
 0xeca   :  { %v800_v56 = vadd.f32 0.5, %v799_v54 }
 0xecc   :  { %v801_v58 = vsel %vm1485_vm5, %v1155_v53, %v800_v56 }
 0xecd   :  { %806 = vrot.lane.b32.xlu2 %v801_v58, %s1252_s22  ;;  %804 = vrot.lane.b32.xlu1 %v801_v58, %s1253_s7 }
 0xece   :  { %802 = vrot.lane.b32.xlu0 %v801_v58, %s1254_s8 }
 0xf27   :  { %v807_v34 = vpop.permute.xlu2 %806 }
 0xf3f   :  { %v805_v36 = vpop.permute.xlu1 %804 }
 0xf40   :  { %v809_v42 = vmul.f32 %v805_v36, %v801_v58  ;;  %v803_v48 = vpop.permute.xlu0 %802 }
 0xf41   :  { %v808_v41 = vmul.f32 %v803_v48, %v2007_v14 }
 0xf43   :  { %v810_v30 = vadd.f32 %v809_v42, %v808_v41 }
 0xf45   :  { %1156 = vtanh.f32 %v810_v30 }
 0xf4b   :  { %v1157_v50 = vpop.eup %1156 }
 0xf4c   :  { %v812_v2 = vmul.f32 %v1157_v50, %v807_v34 }
 0xf4e   :  { %813 = vrot.lane.b32.xlu0 %v812_v2, %s1252_s22  ;;  %v36_v2 = vld [vmem:[%s2086_s3 + $0x28] sm:$0xff] }
 0xfc0   :  { %v814_v4 = vpop.permute.xlu0 %813 }
 0xfc1   :  { %v815_v6 = vsel %vm182_vm1, %v775_v59, %v814_v4  ;;  %v2117_v4 = vld [vmem:[#allocation9_spill] sm:$0xff] }
 0xfc2   :  { %832 = vmatmul.f32.vlgmr.msrb.gmra.mxu1 %v815_v6  ;;  %852 = vmatmul.f32.vlgmr.msrb.gmra.mxu3 %v815_v6  ;;  %v100_v6 = vadd.f32 %v2117_v4, %v36_v2 }
 0xfc4   :  { %v102_v8 = vmax.f32 %v100_v6, 0.0 }
0x103f   :  { %v833_v12 = vpop.f32.mrf.mxu1 }
0x1040   :  { %v857_v15 = vadd.f32 %v856_v10, %v833_v12  ;;  %v1026_v10 = vld [vmem:[#allocation2 + $0x2f0] sm:$0xff]  ;;  %v1025_v12 = vld [vmem:[#allocation2 + $0x2c0] sm:$0xff] }
0x1041   :  { %1027 = vmatpush.msrb.mxu0 %v1026_v10 }
0x1042   :  { %1158 = vtanh.f32 %v857_v15  ;;  %v1023_v15 = vld [vmem:[#allocation2 + $0x260] sm:$0xff] }
0x1043   :  { %1028 = vmatpush.msrb.mxu0 %v1025_v12 }
0x1045   :  { %v853_v18 = vpop.f32.mrf.mxu3  ;;  %1029 = vmatpush.msrb.mxu0 %v1024_v13 }
0x1047   :  { %1030 = vmatpush.msrb.mxu0 %v1023_v15 }
0x1048   :  { %v1159_v19 = vpop.eup %1158 }
0x1049   :  { %v859_v21 = vmul.f32 0.5, %v1159_v19 }
0x104b   :  { %v860_v23 = vadd.f32 0.5, %v859_v21  ;;  %v1021_v21 = vld [vmem:[#allocation2 + $0x200] sm:$0xff] }
0x104d   :  { %v861_v14 = vsel %vm1485_vm5, %v1159_v19, %v860_v23  ;;  %v1022_v19 = vld [vmem:[#allocation2 + $0x230] sm:$0xff] }
0x104e   :  { %866 = vrot.lane.b32.xlu0 %v861_v14, %s1252_s22  ;;  %864 = vrot.lane.b32.xlu2 %v861_v14, %s1253_s7  ;;  %v1020_v23 = vld [vmem:[#allocation2 + $0x1d0] sm:$0xff] }
0x104f   :  { %862 = vrot.lane.b32.xlu1 %v861_v14, %s1254_s8  ;;  %1031 = vmatpush.msrb.mxu0 %v1022_v19 }
0x1051   :  { %1032 = vmatpush.msrb.mxu0 %v1021_v21 }
0x1053   :  { %1033 = vmatpush.msrb.mxu0 %v1020_v23 }
0x10a8   :  { %v865_v22 = vpop.permute.xlu2 %864 }
0x10a9   :  { %v869_v45 = vmul.f32 %v865_v22, %v861_v14  ;;  %v1019_v14 = vld [vmem:[#allocation2 + $0x1a0] sm:$0xff]  ;;  %v1018_v22 = vld [vmem:[#allocation2 + $0x170] sm:$0xff] }
0x10aa   :  { %1034 = vmatpush.msrb.mxu0 %v1019_v14 }
0x10ac   :  { %1035 = vmatpush.msrb.mxu0 %v1018_v22 }
0x10c0   :  { %v867_v0 = vpop.permute.xlu0 %866 }
0x10c1   :  { %v863_v24 = vpop.permute.xlu1 %862 }
0x10c2   :  { %v868_v26 = vmul.f32 %v863_v24, %v773_v49  ;;  %v1017_v24 = vld [vmem:[#allocation2 + $0x140] sm:$0xff] }
0x10c3   :  { %1036 = vmatpush.msrb.mxu0 %v1017_v24 }
0x10c4   :  { %v870_v27 = vadd.f32 %v869_v45, %v868_v26  ;;  %v1016_v45 = vld [vmem:[#allocation2 + $0x110] sm:$0xff]  ;;  %v1015_v26 = vld [vmem:[#allocation2 + $0xe0] sm:$0xff] }
0x10c5   :  { %1037 = vmatpush.msrb.mxu0 %v1016_v45 }
0x10c6   :  { %1160 = vtanh.f32 %v870_v27 }
0x10c7   :  { %1038 = vmatpush.msrb.mxu0 %v1015_v26 }
0x10cc   :  { %v1161_v28 = vpop.eup %1160 }
0x10cd   :  { %v872_v63 = vmul.f32 %v1161_v28, %v867_v0  ;;  %v1013_v28 = vld [vmem:[#allocation2 + $0x80] sm:$0xff]  ;;  %v1012_v0 = vld [vmem:[#allocation2 + $0x50] sm:$0xff] }
0x10cf   :  { %889 = vmatmul.f32.vlgmr.msra.gmra.mxu0 %v872_v63 }
0x114c   :  { %v890_v44 = vpop.f32.mrf.mxu0 }
0x114d   :  { %v893_v47 = vadd.f32 %v890_v44, %v853_v18  ;;  %v1063_v18 = vld [vmem:[#allocation2 + $0x2f8] sm:$0xff]  ;;  %v1062_v44 = vld [vmem:[#allocation2 + $0x2c8] sm:$0xff] }
0x114e   :  { %1064 = vmatpush.msra.mxu2 %v1063_v18 }
0x114f   :  { %v894_v32 = vadd.f32 %v1221_v40, %v893_v47  ;;  %v1061_v47 = vld [vmem:[#allocation2 + $0x298] sm:$0xff] }
0x1150   :  { %1065 = vmatpush.msra.mxu2 %v1062_v44 }
0x1151   :  { %1162 = vtanh.f32 %v894_v32  ;;  %v1059_v32 = vld [vmem:[#allocation2 + $0x238] sm:$0xff] }
0x1152   :  { %1066 = vmatpush.msra.mxu2 %v1061_v47 }
0x1157   :  { %v1163_v39 = vpop.eup %1162 }
0x1158   :  { %v896_v25 = vmul.f32 0.5, %v1163_v39 }
0x115a   :  { %v897_v29 = vadd.f32 0.5, %v896_v25  ;;  %v1057_v25 = vld [vmem:[#allocation2 + $0x1d8] sm:$0xff] }
0x115c   :  { %v898_v31 = vsel %vm1485_vm5, %v1163_v39, %v897_v29  ;;  %v1058_v39 = vld [vmem:[#allocation2 + $0x208] sm:$0xff] }
0x115d   :  { %903 = vrot.lane.b32.xlu0 %v898_v31, %s1252_s22  ;;  %901 = vrot.lane.b32.xlu2 %v898_v31, %s1253_s7  ;;  %v1056_v29 = vld [vmem:[#allocation2 + $0x1a8] sm:$0xff] }
0x115e   :  { %899 = vrot.lane.b32.xlu1 %v898_v31, %s1254_s8 }
0x11b7   :  { %v902_v11 = vpop.permute.xlu2 %901 }
0x11b8   :  { %v906_v17 = vmul.f32 %v902_v11, %v898_v31  ;;  %v1055_v11 = vld [vmem:[#allocation2 + $0x178] sm:$0xff] }
0x11cf   :  { %v904_v5 = vpop.permute.xlu0 %903 }
0x11d0   :  { %v900_v43 = vpop.permute.xlu1 %899 }
0x11d1   :  { %v905_v20 = vmul.f32 %v900_v43, %v810_v30 }
0x11d3   :  { %v2048_v16 = vadd.f32 %v906_v17, %v905_v20 }
0x11d5   :  { %1164 = vtanh.f32 %v2048_v16 }
0x11db   :  { %v1165_v3 = vpop.eup %1164 }
0x11dc   :  { %v909_v7 = vmul.f32 %v1165_v3, %v904_v5  ;;  %v1054_v3 = vld [vmem:[#allocation2 + $0x148] sm:$0xff] }
0x11de   :  { %910 = vrot.lane.b32.xlu1 %v909_v7, %s1252_s22  ;;  %v1053_v7 = vld [vmem:[#allocation2 + $0x118] sm:$0xff] }
0x1250   :  { %v911_v33 = vpop.permute.xlu1 %910 }
0x1251   :  { %v912_v9 = vsel %vm182_vm1, %v872_v63, %v911_v33  ;;  %v1011_v63 = vld [vmem:[#allocation2 + $0x20] sm:$0xff]  ;;  %v1052_v33 = vld [vmem:[#allocation2 + $0xe8] sm:$0xff] }
0x1252   :  { %929 = vmatmul.f32.vlgmr.msrb.gmra.mxu2 %v912_v9  ;;  %949 = vmatmul.f32.vlgmr.msra.gmra.mxu1 %v912_v9  ;;  %v1051_v9 = vld [vmem:[#allocation2 + $0xb8] sm:$0xff] }
0x12cf   :  { %v950_v58 = vpop.f32.mrf.mxu1 }
0x12d5   :  { %v930_v35 = vpop.f32.mrf.mxu2 }
0x12d6   :  { %v954_v46 = vadd.f32 %v953_v62, %v930_v35 }
0x12d8   :  { %1166 = vtanh.f32 %v954_v46 }
0x12de   :  { %v1167_v49 = vpop.eup %1166 }
0x12df   :  { %v956_v55 = vmul.f32 0.5, %v1167_v49 }
0x12e1   :  { %v957_v57 = vadd.f32 0.5, %v956_v55  ;;  %v1050_v55 = vld [vmem:[#allocation2 + $0x88] sm:$0xff] }
0x12e3   :  { %v958_v59 = vsel %vm1485_vm5, %v1167_v49, %v957_v57  ;;  %v1049_v57 = vld [vmem:[#allocation2 + $0x58] sm:$0xff] }
0x12e4   :  { %963 = vrot.lane.b32.xlu1 %v958_v59, %s1252_s22  ;;  %961 = vrot.lane.b32.xlu0 %v958_v59, %s1253_s7 }
0x12e5   :  { %959 = vrot.lane.b32.xlu2 %v958_v59, %s1254_s8 }
0x133f   :  { %v960_v61 = vpop.permute.xlu2 %959 }
0x1340   :  { %v965_v37 = vmul.f32 %v960_v61, %v870_v27  ;;  %v1014_v27 = vld [vmem:[#allocation2 + $0xb0] sm:$0xff] }
0x1341   :  { %1039 = vmatpush.msrb.mxu0 %v1014_v27  ;;  %v37_v61 = vld [vmem:[%s2086_s3 + $0x30] sm:$0xff] }
0x1343   :  { %1040 = vmatpush.msrb.mxu0 %v1013_v28 }
0x1345   :  { %1041 = vmatpush.msrb.mxu0 %v1012_v0 }
0x1347   :  { %1042 = vmatpush.msrb.mxu0 %v1011_v63 }
0x1356   :  { %v962_v1 = vpop.permute.xlu0 %961  ;;  %v964_v54 = vpop.permute.xlu1 %963 }
0x1357   :  { %v966_v51 = vmul.f32 %v962_v1, %v958_v59  ;;  %v1048_v59 = vld [vmem:[#allocation2 + $0x28] sm:$0xff] }
0x1359   :  { %v967_v52 = vadd.f32 %v966_v51, %v965_v37 }
0x135b   :  { %1168 = vtanh.f32 %v967_v52 }
0x1361   :  { %v1169_v53 = vpop.eup %1168 }
0x1362   :  { %v969_v56 = vmul.f32 %v1169_v53, %v964_v54 }
0x1364   :  { %986 = vmatmul.f32.vlgmr.msra.gmra.mxu3 %v969_v56 }
0x13e7   :  { %v987_v36 = vpop.f32.mrf.mxu3 }
0x13e8   :  { %v990_v42 = vadd.f32 %v987_v36, %v950_v58 }
0x13ea   :  { %v991_v48 = vadd.f32 %v1221_v40, %v990_v42  ;;  %v1060_v40 = vld [vmem:[#allocation2 + $0x268] sm:$0xff] }
0x13eb   :  { %1067 = vmatpush.msra.mxu2 %v1060_v40 }
0x13ec   :  { %1170 = vtanh.f32 %v991_v48 }
0x13ed   :  { %1068 = vmatpush.msra.mxu2 %v1059_v32 }
0x13ef   :  { %1069 = vmatpush.msra.mxu2 %v1058_v39 }
0x13f1   :  { %1070 = vmatpush.msra.mxu2 %v1057_v25 }
0x13f2   :  { %v1171_v41 = vpop.eup %1170 }
0x13f3   :  { %v993_v30 = vmul.f32 0.5, %v1171_v41  ;;  %1071 = vmatpush.msra.mxu2 %v1056_v29 }
0x13f5   :  { %v994_v50 = vadd.f32 0.5, %v993_v30  ;;  %1072 = vmatpush.msra.mxu2 %v1055_v11 }
0x13f7   :  { %v995_v34 = vsel %vm1485_vm5, %v1171_v41, %v994_v50  ;;  %1073 = vmatpush.msra.mxu2 %v1054_v3 }
0x13f8   :  { %1000 = vrot.lane.b32.xlu1 %v995_v34, %s1252_s22  ;;  %998 = vrot.lane.b32.xlu0 %v995_v34, %s1253_s7 }
0x13f9   :  { %996 = vrot.lane.b32.xlu2 %v995_v34, %s1254_s8  ;;  %1074 = vmatpush.msra.mxu2 %v1053_v7 }
0x13fb   :  { %1075 = vmatpush.msra.mxu2 %v1052_v33 }
0x13fd   :  { %1076 = vmatpush.msra.mxu2 %v1051_v9 }
0x13ff   :  { %1077 = vmatpush.msra.mxu2 %v1050_v55 }
0x1401   :  { %1008 = vrot.lane.b32.xlu2 %v102_v8, %s1252_s22  ;;  %1078 = vmatpush.msra.mxu2 %v1049_v57 }
0x1403   :  { %1079 = vmatpush.msra.mxu2 %v1048_v59 }
0x1453   :  { %v997_v31 = vpop.permute.xlu2 %996 }
0x1454   :  { %v1002_v17 = vmul.f32 %v997_v31, %v2048_v16 }
0x145b   :  { %v1009_v46 = vpop.permute.xlu2 %1008 }
0x146a   :  { %v999_v43 = vpop.permute.xlu0 %998  ;;  %v1001_v62 = vpop.permute.xlu1 %1000 }
0x146b   :  { %v1003_v20 = vmul.f32 %v999_v43, %v995_v34 }
0x146d   :  { %v1004_v5 = vadd.f32 %v1003_v20, %v1002_v17 }
0x146f   :  { %1172 = vtanh.f32 %v1004_v5 }
0x1475   :  { %v1173_v60 = vpop.eup %1172 }
0x1476   :  { %v1006_v35 = vmul.f32 %v1173_v60, %v1001_v62 }
0x1478   :  { %v1007_v49 = vsel %vm182_vm1, %v1006_v35, 0.0 }
0x1479   :  { %v1010_v16 = vadd.f32 %v1009_v46, %v1007_v49 }
0x147b   :  { %1043 = vmatmul.f32.vlgmr.msrb.gmra.mxu0 %v1010_v16 }
0x14f8   :  { %v1044_v1 = vpop.f32.mrf.mxu0 }
0x14f9   :  { %v1045_v37 = vadd.f32 %v1044_v1, %v37_v61 }
0x14fb   :  { %v1047_v51 = vmax.f32 %v1045_v37, 0.0 }
0x14fd   :  { %1080 = vmatmul.f32.vlgmr.msra.gmra.mxu2 %v1047_v51 }
0x1580   :  { %v1081_v52 = vpop.f32.mrf.mxu2 }
0x1581   :  { %v1082_v53 = vadd.f32 %v1081_v52, %v38_v38 }
0x1583   :  { %1084 = vst [vmem:[%s2087_s4] sm:$0xff] %v1082_v53 }
0x1584   :  { %1089 = vsyncpa [#allocation3], 1 }

</bundles_post_ra>
